<compile_context>
chip_gen: v5e
topology: v5e:2x2
jax: 0.10.0
libtpu: 0.0.40
codegen_flags: <defaults>
</compile_context>

<pallas_src>
import functools

import numpy as np

import jax
import jax.numpy as jnp
from jax import lax
from jax.experimental import pallas as pl
from jax.experimental.pallas import tpu as pltpu

LANE = 128  # TPU lane width; every in-kernel lane group is padded to this.


# --------------------------------------------------------------------------
# PyTorch-style parameter init (deterministic, uniform +-1/sqrt(fan_in))
# --------------------------------------------------------------------------
def init_lenet_params(key):
    def uniform(k, shape, fan_in):
        bound = 1.0 / jnp.sqrt(jnp.float32(fan_in))
        return jax.random.uniform(k, shape, jnp.float32, -bound, bound)

    ks = jax.random.split(key, 10)
    return {
        "conv1_w": uniform(ks[0], (6, 3, 5, 5), 3 * 5 * 5),
        "conv1_b": uniform(ks[1], (6,), 3 * 5 * 5),
        "conv2_w": uniform(ks[2], (16, 6, 5, 5), 6 * 5 * 5),
        "conv2_b": uniform(ks[3], (16,), 6 * 5 * 5),
        "fc1_w": uniform(ks[4], (120, 400), 400),   # PyTorch (out, in)
        "fc1_b": uniform(ks[5], (120,), 400),
        "fc2_w": uniform(ks[6], (84, 120), 120),
        "fc2_b": uniform(ks[7], (84,), 120),
        "fc3_w": uniform(ks[8], (10, 84), 84),
        "fc3_b": uniform(ks[9], (10,), 84),
    }


# --------------------------------------------------------------------------
# One-time (init) transformation of the PyTorch weights into kernel constants
# --------------------------------------------------------------------------
def _conv_pool_band(w, in_w, in_lane_pad=LANE, out_lane_pad=LANE):
    """Per-batch stacked banded matrix for a VALID 5x5 conv expressed as one
    matmul (kernel-row dim kh folded into K), with the even/odd column
    selection of the following 2x2 max-pool folded into two N halves.

    Input lanes  : c*in_w + w   (zero rows for padding lanes up to in_lane_pad)
    Output lanes : oc*owp + j   (padded to out_lane_pad); even half | odd half
    Shape: (KH*in_lane_pad, 2*out_lane_pad).
    """
    oc_n, c_n, kh_n, kw_n = w.shape
    ow = in_w - kw_n + 1
    owp = ow // 2
    band = np.zeros((kh_n, in_lane_pad, 2, out_lane_pad), np.float32)
    for kh in range(kh_n):
        for c in range(c_n):
            for kw in range(kw_n):
                for par in range(2):            # even / odd pooled column
                    for j in range(owp):
                        wcol = 2 * j + par + kw
                        if wcol < in_w:
                            band[kh, c * in_w + wcol, par,
                                 j:oc_n * owp:owp] += w[:, c, kh, kw]
    return band.reshape(kh_n * in_lane_pad, 2 * out_lane_pad)


def _row_pool_selectors(n_in):
    """(n_in//2, n_in) 0/1 matrices selecting even / odd rows (height pool)."""
    e = np.zeros((n_in // 2, n_in), np.float32)
    o = np.zeros((n_in // 2, n_in), np.float32)
    idx = np.arange(n_in // 2)
    e[idx, 2 * idx] = 1.0
    o[idx, 2 * idx + 1] = 1.0
    return e, o


def prepare_lenet_params(params):
    """Runs once at init: builds the fused-kernel constant set (batch-free)."""
    w1 = np.asarray(params["conv1_w"], np.float32)
    b1 = np.asarray(params["conv1_b"], np.float32)
    w2c = np.asarray(params["conv2_w"], np.float32)
    b2 = np.asarray(params["conv2_b"], np.float32)
    fw1 = np.asarray(params["fc1_w"], np.float32)
    fb1 = np.asarray(params["fc1_b"], np.float32)
    fw2 = np.asarray(params["fc2_w"], np.float32)
    fb2 = np.asarray(params["fc2_b"], np.float32)
    fw3 = np.asarray(params["fc3_w"], np.float32)
    fb3 = np.asarray(params["fc3_b"], np.float32)

    band1 = _conv_pool_band(w1, in_w=32)          # (640, 256)
    band2 = _conv_pool_band(w2c, in_w=14)         # (640, 256)
    rp1e, rp1o = _row_pool_selectors(28)          # (14, 28)
    rp2e, rp2o = _row_pool_selectors(10)          # (5, 10)

    b1p = np.zeros((1, LANE), np.float32)
    b1p[0, :6 * 14] = np.repeat(b1, 14)           # lanes = (oc, pooled_w)
    b2p = np.zeros((1, LANE), np.float32)
    b2p[0, :16 * 5] = np.repeat(b2, 5)

    # fc1 weight with the NCHW flatten permutation + p2 lane padding folded in:
    # lhs3[0, oh*128 + oc*5 + ow] = p2[oh, oc*5 + ow]   (lanes >=80 are zero)
    v1p = np.zeros((5 * LANE, 120), np.float32)
    t = fw1.reshape(120, 16, 5, 5).transpose(2, 1, 3, 0).reshape(5, 80, 120)
    for oh in range(5):
        v1p[oh * LANE: oh * LANE + 80, :] = t[oh]

    # fc3 weight/bias padded to 128 output lanes -> lane-dense output store.
    w3p = np.zeros((84, LANE), np.float32)
    w3p[:, :10] = fw3.T
    fb3p = np.zeros((1, LANE), np.float32)
    fb3p[0, :10] = fb3

    bf = lambda a: jnp.asarray(a, jnp.bfloat16)
    f32 = lambda a: jnp.asarray(a, jnp.float32)
    return {
        "band1": bf(band1), "band2": bf(band2),
        "rp1e": f32(rp1e), "rp1o": f32(rp1o),
        "rp2e": f32(rp2e), "rp2o": f32(rp2o),
        "b1p": f32(b1p), "b2p": f32(b2p),
        "v1": bf(v1p), "fb1": f32(fb1[None, :]),
        "w2": bf(np.ascontiguousarray(fw2.T)), "fb2": f32(fb2[None, :]),
        "w3": bf(w3p), "fb3": f32(fb3p),
    }


# --------------------------------------------------------------------------
# The fused Pallas kernel: one grid step = one sample's full forward pass
# --------------------------------------------------------------------------
def _lenet_kernel(x_ref, band1_ref, rp1e_ref, rp1o_ref, b1_ref,
                  band2_ref, rp2e_ref, rp2o_ref, b2_ref,
                  v1_ref, fb1_ref, w2_ref, fb2_ref, w3_ref, fb3_ref,
                  out_ref):
    f32 = jnp.float32
    bf16 = jnp.bfloat16
    KH = 5

    # ---- conv1 + fused 2x2 max-pool: one K=640, N=256 MXU contraction ------
    x = x_ref[0]                                                    # (32, 128)
    lhs1 = jnp.concatenate([x[kh:kh + 28, :] for kh in range(KH)], axis=1)
    r1 = jnp.dot(lhs1.astype(bf16), band1_ref[...],
                 preferred_element_type=f32)                        # (28, 256)
    wmax1 = jnp.maximum(r1[:, :LANE], r1[:, LANE:])                 # width pool
    p1 = jnp.maximum(
        jnp.dot(rp1e_ref[...], wmax1, preferred_element_type=f32),
        jnp.dot(rp1o_ref[...], wmax1, preferred_element_type=f32))  # height pool
    p1 = p1 + b1_ref[...]                                           # (14, 128)

    # ---- conv2 + fused 2x2 max-pool ----------------------------------------
    lhs2 = jnp.concatenate([p1[kh:kh + 10, :] for kh in range(KH)], axis=1)
    r2 = jnp.dot(lhs2.astype(bf16), band2_ref[...],
                 preferred_element_type=f32)                        # (10, 256)
    wmax2 = jnp.maximum(r2[:, :LANE], r2[:, LANE:])
    p2 = jnp.maximum(
        jnp.dot(rp2e_ref[...], wmax2, preferred_element_type=f32),
        jnp.dot(rp2o_ref[...], wmax2, preferred_element_type=f32))
    p2 = p2 + b2_ref[...]                                           # (5, 128)

    # ---- fc1 + relu + fc2 + relu + fc3 (flatten folded into v1) ------------
    lhs3 = jnp.concatenate([p2[oh:oh + 1, :] for oh in range(KH)], axis=1)
    f1 = jnp.dot(lhs3.astype(bf16), v1_ref[...],
                 preferred_element_type=f32) + fb1_ref[...]         # (1, 120)
    f1 = jnp.maximum(f1, 0.0)
    f2 = jnp.dot(f1.astype(bf16), w2_ref[...],
                 preferred_element_type=f32) + fb2_ref[...]         # (1, 84)
    f2 = jnp.maximum(f2, 0.0)
    f3 = jnp.dot(f2.astype(bf16), w3_ref[...],
                 preferred_element_type=f32) + fb3_ref[...]         # (1, 128)
    out_ref[0] = f3                                                 # lane-dense


def _const_spec(arr):
    # Full-array block, constant index map -> fetched once, resident across steps.
    return pl.BlockSpec(arr.shape, lambda b: (0,) * arr.ndim)


@jax.jit
def lenet_forward(x_nchw, consts):
    """x_nchw: (B, 3, 32, 32) float32, consts from prepare_lenet_params."""
    B, C, H, W = x_nchw.shape
    assert (C, H, W) == (3, 32, 32), "constants were built for 3x32x32 input"
    x = x_nchw.astype(jnp.float32)
    # Only XLA glue on the input path: rows = h, lanes = (c, w) padded to 128.
    x0 = jnp.transpose(x, (0, 2, 1, 3)).reshape(B, H, C * W)
    x0 = jnp.pad(x0, ((0, 0), (0, 0), (0, LANE - C * W)))            # (B,32,128)

    names = ("band1", "rp1e", "rp1o", "b1p", "band2", "rp2e", "rp2o", "b2p",
             "v1", "fb1", "w2", "fb2", "w3", "fb3")
    cargs = tuple(consts[n] for n in names)

    out = pl.pallas_call(
        _lenet_kernel,
        out_shape=jax.ShapeDtypeStruct((B, 1, LANE), jnp.float32),
        grid=(B,),
        in_specs=[pl.BlockSpec((1, H, LANE), lambda b: (b, 0, 0))]
                 + [_const_spec(a) for a in cargs],
        out_specs=pl.BlockSpec((1, 1, LANE), lambda b: (b, 0, 0)),
        compiler_params=pltpu.CompilerParams(
            dimension_semantics=("parallel",)),
    )(x0, *cargs)
    return out.reshape(B, LANE)[:, :10]


# --------------------------------------------------------------------------
# Plain-JAX reference (matches the PyTorch module) for the self-check
# --------------------------------------------------------------------------
def lenet_reference(x, params):
    conv = functools.partial(
        lax.conv_general_dilated, window_strides=(1, 1), padding="VALID",
        dimension_numbers=("NCHW", "OIHW", "NCHW"),
        precision=lax.Precision.HIGHEST)

    def pool(a):
        return jnp.maximum(
            jnp.maximum(a[:, :, 0::2, 0::2], a[:, :, 0::2, 1::2]),
            jnp.maximum(a[:, :, 1::2, 0::2], a[:, :, 1::2, 1::2]))

    h = conv(x, params["conv1_w"]) + params["conv1_b"][None, :, None, None]
    h = pool(h)
    h = conv(h, params["conv2_w"]) + params["conv2_b"][None, :, None, None]
    h = pool(h)
    h = h.reshape(h.shape[0], -1)
    hp = lax.Precision.HIGHEST
    h = jnp.maximum(jnp.dot(h, params["fc1_w"].T, precision=hp)
                    + params["fc1_b"], 0.0)
    h = jnp.maximum(jnp.dot(h, params["fc2_w"].T, precision=hp)
                    + params["fc2_b"], 0.0)
    return jnp.dot(h, params["fc3_w"].T, precision=hp) + params["fc3_b"]


if __name__ == "__main__":
    key = jax.random.PRNGKey(0)
    k_params, k_x = jax.random.split(key)
    params = init_lenet_params(k_params)
    consts = prepare_lenet_params(params)            # one-time prep (batch-free)

    batch = 2
    # fc1 has in_features=400 => input must be (B, 3, 32, 32)
    x = jax.random.normal(k_x, (batch, 3, 32, 32), dtype=jnp.float32)

    out = jax.block_until_ready(lenet_forward(x, consts))
    assert out.shape == (batch, 10), out.shape

    # Self-check vs a plain-JAX f32 reference (bf16 matmul operands + f32
    # accumulation keep the error well inside this tolerance at LeNet scale).
    ref = lenet_reference(x, params)
    np.testing.assert_allclose(np.asarray(out), np.asarray(ref),
                               rtol=5e-2, atol=5e-2)

    print("KERNEL_OK")
</pallas_src>

<mosaic_0001>
module attributes {stable_mosaic.version = 11 : i64} {
  func.func @_lenet_kernel(%arg0: i32, %arg1: memref<1x32x128xf32, #tpu.memory_space<vmem>>, %arg2: memref<640x256xbf16, #tpu.memory_space<vmem>>, %arg3: memref<14x28xf32, #tpu.memory_space<vmem>>, %arg4: memref<14x28xf32, #tpu.memory_space<vmem>>, %arg5: memref<1x128xf32, #tpu.memory_space<vmem>>, %arg6: memref<640x256xbf16, #tpu.memory_space<vmem>>, %arg7: memref<5x10xf32, #tpu.memory_space<vmem>>, %arg8: memref<5x10xf32, #tpu.memory_space<vmem>>, %arg9: memref<1x128xf32, #tpu.memory_space<vmem>>, %arg10: memref<640x120xbf16, #tpu.memory_space<vmem>>, %arg11: memref<1x120xf32, #tpu.memory_space<vmem>>, %arg12: memref<120x84xbf16, #tpu.memory_space<vmem>>, %arg13: memref<1x84xf32, #tpu.memory_space<vmem>>, %arg14: memref<84x128xbf16, #tpu.memory_space<vmem>>, %arg15: memref<1x128xf32, #tpu.memory_space<vmem>>, %arg16: memref<1x1x128xf32, #tpu.memory_space<vmem>>) attributes {dimension_semantics = [#tpu.dimension_semantics<parallel>], iteration_bounds = array<i64: 2>, scalar_prefetch = 0 : i64, scratch_operands = 0 : i64, tpu.core_type = #tpu.core_type<tc>, window_params = [{transform_indices = @transform_0, window_bounds = array<i64: 1, 32, 128>}, {pipeline_mode = #tpu.pipeline_mode<synchronous>, transform_indices = @transform_1, window_bounds = array<i64: 640, 256>}, {pipeline_mode = #tpu.pipeline_mode<synchronous>, transform_indices = @transform_2, window_bounds = array<i64: 14, 28>}, {pipeline_mode = #tpu.pipeline_mode<synchronous>, transform_indices = @transform_3, window_bounds = array<i64: 14, 28>}, {pipeline_mode = #tpu.pipeline_mode<synchronous>, transform_indices = @transform_4, window_bounds = array<i64: 1, 128>}, {pipeline_mode = #tpu.pipeline_mode<synchronous>, transform_indices = @transform_5, window_bounds = array<i64: 640, 256>}, {pipeline_mode = #tpu.pipeline_mode<synchronous>, transform_indices = @transform_6, window_bounds = array<i64: 5, 10>}, {pipeline_mode = #tpu.pipeline_mode<synchronous>, transform_indices = @transform_7, window_bounds = array<i64: 5, 10>}, {pipeline_mode = #tpu.pipeline_mode<synchronous>, transform_indices = @transform_8, window_bounds = array<i64: 1, 128>}, {pipeline_mode = #tpu.pipeline_mode<synchronous>, transform_indices = @transform_9, window_bounds = array<i64: 640, 120>}, {pipeline_mode = #tpu.pipeline_mode<synchronous>, transform_indices = @transform_10, window_bounds = array<i64: 1, 120>}, {pipeline_mode = #tpu.pipeline_mode<synchronous>, transform_indices = @transform_11, window_bounds = array<i64: 120, 84>}, {pipeline_mode = #tpu.pipeline_mode<synchronous>, transform_indices = @transform_12, window_bounds = array<i64: 1, 84>}, {pipeline_mode = #tpu.pipeline_mode<synchronous>, transform_indices = @transform_13, window_bounds = array<i64: 84, 128>}, {pipeline_mode = #tpu.pipeline_mode<synchronous>, transform_indices = @transform_14, window_bounds = array<i64: 1, 128>}, {transform_indices = @transform_15, window_bounds = array<i64: 1, 1, 128>}]} {
    %c0 = arith.constant 0 : index
    %c0_0 = arith.constant 0 : index
    %c0_1 = arith.constant 0 : index
    %0 = vector.load %arg1[%c0, %c0_0, %c0_1] : memref<1x32x128xf32, #tpu.memory_space<vmem>>, vector<1x32x128xf32>
    %1 = vector.shape_cast %0 : vector<1x32x128xf32> to vector<32x128xf32>
    %2 = vector.extract_strided_slice %1 {offsets = [0, 0], sizes = [28, 128], strides = [1, 1]} : vector<32x128xf32> to vector<28x128xf32>
    %3 = vector.extract_strided_slice %1 {offsets = [1, 0], sizes = [28, 128], strides = [1, 1]} : vector<32x128xf32> to vector<28x128xf32>
    %4 = vector.extract_strided_slice %1 {offsets = [2, 0], sizes = [28, 128], strides = [1, 1]} : vector<32x128xf32> to vector<28x128xf32>
    %5 = vector.extract_strided_slice %1 {offsets = [3, 0], sizes = [28, 128], strides = [1, 1]} : vector<32x128xf32> to vector<28x128xf32>
    %6 = vector.extract_strided_slice %1 {offsets = [4, 0], sizes = [28, 128], strides = [1, 1]} : vector<32x128xf32> to vector<28x128xf32>
    %7 = tpu.concatenate %2, %3, %4, %5, %6 in 1 : vector<28x128xf32>, vector<28x128xf32>, vector<28x128xf32>, vector<28x128xf32>, vector<28x128xf32> -> vector<28x640xf32>
    %8 = arith.truncf %7 : vector<28x640xf32> to vector<28x640xbf16>
    %c0_2 = arith.constant 0 : index
    %c0_3 = arith.constant 0 : index
    %9 = vector.load %arg2[%c0_2, %c0_3] : memref<640x256xbf16, #tpu.memory_space<vmem>>, vector<640x256xbf16>
    %cst = arith.constant dense<0.000000e+00> : vector<28x256xf32>
    %10 = tpu.matmul %8, %9, %cst {dimension_numbers = #tpu.dot_dimension_numbers<[1], [0], [0], [1], [0, 0, 1, 1], [], []>} : vector<28x640xbf16>, vector<640x256xbf16>, vector<28x256xf32> -> vector<28x256xf32>
    %11 = vector.extract_strided_slice %10 {offsets = [0, 0], sizes = [28, 128], strides = [1, 1]} : vector<28x256xf32> to vector<28x128xf32>
    %12 = vector.extract_strided_slice %10 {offsets = [0, 128], sizes = [28, 128], strides = [1, 1]} : vector<28x256xf32> to vector<28x128xf32>
    %13 = arith.maximumf %11, %12 : vector<28x128xf32>
    %c0_4 = arith.constant 0 : index
    %c0_5 = arith.constant 0 : index
    %14 = vector.load %arg3[%c0_4, %c0_5] : memref<14x28xf32, #tpu.memory_space<vmem>>, vector<14x28xf32>
    %cst_6 = arith.constant dense<0.000000e+00> : vector<14x128xf32>
    %15 = tpu.matmul %14, %13, %cst_6 {dimension_numbers = #tpu.dot_dimension_numbers<[1], [0], [0], [1], [0, 0, 1, 1], [], []>} : vector<14x28xf32>, vector<28x128xf32>, vector<14x128xf32> -> vector<14x128xf32>
    %c0_7 = arith.constant 0 : index
    %c0_8 = arith.constant 0 : index
    %16 = vector.load %arg4[%c0_7, %c0_8] : memref<14x28xf32, #tpu.memory_space<vmem>>, vector<14x28xf32>
    %cst_9 = arith.constant dense<0.000000e+00> : vector<14x128xf32>
    %17 = tpu.matmul %16, %13, %cst_9 {dimension_numbers = #tpu.dot_dimension_numbers<[1], [0], [0], [1], [0, 0, 1, 1], [], []>} : vector<14x28xf32>, vector<28x128xf32>, vector<14x128xf32> -> vector<14x128xf32>
    %18 = arith.maximumf %15, %17 : vector<14x128xf32>
    %c0_10 = arith.constant 0 : index
    %c0_11 = arith.constant 0 : index
    %19 = vector.load %arg5[%c0_10, %c0_11] : memref<1x128xf32, #tpu.memory_space<vmem>>, vector<1x128xf32>
    %20 = vector.broadcast %19 : vector<1x128xf32> to vector<14x128xf32>
    %21 = arith.addf %18, %20 : vector<14x128xf32>
    %22 = vector.extract_strided_slice %21 {offsets = [0, 0], sizes = [10, 128], strides = [1, 1]} : vector<14x128xf32> to vector<10x128xf32>
    %23 = vector.extract_strided_slice %21 {offsets = [1, 0], sizes = [10, 128], strides = [1, 1]} : vector<14x128xf32> to vector<10x128xf32>
    %24 = vector.extract_strided_slice %21 {offsets = [2, 0], sizes = [10, 128], strides = [1, 1]} : vector<14x128xf32> to vector<10x128xf32>
    %25 = vector.extract_strided_slice %21 {offsets = [3, 0], sizes = [10, 128], strides = [1, 1]} : vector<14x128xf32> to vector<10x128xf32>
    %26 = vector.extract_strided_slice %21 {offsets = [4, 0], sizes = [10, 128], strides = [1, 1]} : vector<14x128xf32> to vector<10x128xf32>
    %27 = tpu.concatenate %22, %23, %24, %25, %26 in 1 : vector<10x128xf32>, vector<10x128xf32>, vector<10x128xf32>, vector<10x128xf32>, vector<10x128xf32> -> vector<10x640xf32>
    %28 = arith.truncf %27 : vector<10x640xf32> to vector<10x640xbf16>
    %c0_12 = arith.constant 0 : index
    %c0_13 = arith.constant 0 : index
    %29 = vector.load %arg6[%c0_12, %c0_13] : memref<640x256xbf16, #tpu.memory_space<vmem>>, vector<640x256xbf16>
    %cst_14 = arith.constant dense<0.000000e+00> : vector<10x256xf32>
    %30 = tpu.matmul %28, %29, %cst_14 {dimension_numbers = #tpu.dot_dimension_numbers<[1], [0], [0], [1], [0, 0, 1, 1], [], []>} : vector<10x640xbf16>, vector<640x256xbf16>, vector<10x256xf32> -> vector<10x256xf32>
    %31 = vector.extract_strided_slice %30 {offsets = [0, 0], sizes = [10, 128], strides = [1, 1]} : vector<10x256xf32> to vector<10x128xf32>
    %32 = vector.extract_strided_slice %30 {offsets = [0, 128], sizes = [10, 128], strides = [1, 1]} : vector<10x256xf32> to vector<10x128xf32>
    %33 = arith.maximumf %31, %32 : vector<10x128xf32>
    %c0_15 = arith.constant 0 : index
    %c0_16 = arith.constant 0 : index
    %34 = vector.load %arg7[%c0_15, %c0_16] : memref<5x10xf32, #tpu.memory_space<vmem>>, vector<5x10xf32>
    %cst_17 = arith.constant dense<0.000000e+00> : vector<5x128xf32>
    %35 = tpu.matmul %34, %33, %cst_17 {dimension_numbers = #tpu.dot_dimension_numbers<[1], [0], [0], [1], [0, 0, 1, 1], [], []>} : vector<5x10xf32>, vector<10x128xf32>, vector<5x128xf32> -> vector<5x128xf32>
    %c0_18 = arith.constant 0 : index
    %c0_19 = arith.constant 0 : index
    %36 = vector.load %arg8[%c0_18, %c0_19] : memref<5x10xf32, #tpu.memory_space<vmem>>, vector<5x10xf32>
    %cst_20 = arith.constant dense<0.000000e+00> : vector<5x128xf32>
    %37 = tpu.matmul %36, %33, %cst_20 {dimension_numbers = #tpu.dot_dimension_numbers<[1], [0], [0], [1], [0, 0, 1, 1], [], []>} : vector<5x10xf32>, vector<10x128xf32>, vector<5x128xf32> -> vector<5x128xf32>
    %38 = arith.maximumf %35, %37 : vector<5x128xf32>
    %c0_21 = arith.constant 0 : index
    %c0_22 = arith.constant 0 : index
    %39 = vector.load %arg9[%c0_21, %c0_22] : memref<1x128xf32, #tpu.memory_space<vmem>>, vector<1x128xf32>
    %40 = vector.broadcast %39 : vector<1x128xf32> to vector<5x128xf32>
    %41 = arith.addf %38, %40 : vector<5x128xf32>
    %42 = vector.extract_strided_slice %41 {offsets = [0, 0], sizes = [1, 128], strides = [1, 1]} : vector<5x128xf32> to vector<1x128xf32>
    %43 = vector.extract_strided_slice %41 {offsets = [1, 0], sizes = [1, 128], strides = [1, 1]} : vector<5x128xf32> to vector<1x128xf32>
    %44 = vector.extract_strided_slice %41 {offsets = [2, 0], sizes = [1, 128], strides = [1, 1]} : vector<5x128xf32> to vector<1x128xf32>
    %45 = vector.extract_strided_slice %41 {offsets = [3, 0], sizes = [1, 128], strides = [1, 1]} : vector<5x128xf32> to vector<1x128xf32>
    %46 = vector.extract_strided_slice %41 {offsets = [4, 0], sizes = [1, 128], strides = [1, 1]} : vector<5x128xf32> to vector<1x128xf32>
    %47 = tpu.concatenate %42, %43, %44, %45, %46 in 1 : vector<1x128xf32>, vector<1x128xf32>, vector<1x128xf32>, vector<1x128xf32>, vector<1x128xf32> -> vector<1x640xf32>
    %48 = arith.truncf %47 : vector<1x640xf32> to vector<1x640xbf16>
    %c0_23 = arith.constant 0 : index
    %c0_24 = arith.constant 0 : index
    %49 = vector.load %arg10[%c0_23, %c0_24] : memref<640x120xbf16, #tpu.memory_space<vmem>>, vector<640x120xbf16>
    %cst_25 = arith.constant dense<0.000000e+00> : vector<1x120xf32>
    %50 = tpu.matmul %48, %49, %cst_25 {dimension_numbers = #tpu.dot_dimension_numbers<[1], [0], [0], [1], [0, 0, 1, 1], [], []>} : vector<1x640xbf16>, vector<640x120xbf16>, vector<1x120xf32> -> vector<1x120xf32>
    %c0_26 = arith.constant 0 : index
    %c0_27 = arith.constant 0 : index
    %51 = vector.load %arg11[%c0_26, %c0_27] : memref<1x120xf32, #tpu.memory_space<vmem>>, vector<1x120xf32>
    %52 = arith.addf %50, %51 : vector<1x120xf32>
    %cst_28 = arith.constant 0.000000e+00 : f32
    %53 = vector.broadcast %cst_28 : f32 to vector<1x120xf32>
    %54 = arith.maximumf %52, %53 : vector<1x120xf32>
    %55 = arith.truncf %54 : vector<1x120xf32> to vector<1x120xbf16>
    %c0_29 = arith.constant 0 : index
    %c0_30 = arith.constant 0 : index
    %56 = vector.load %arg12[%c0_29, %c0_30] : memref<120x84xbf16, #tpu.memory_space<vmem>>, vector<120x84xbf16>
    %cst_31 = arith.constant dense<0.000000e+00> : vector<1x84xf32>
    %57 = tpu.matmul %55, %56, %cst_31 {dimension_numbers = #tpu.dot_dimension_numbers<[1], [0], [0], [1], [0, 0, 1, 1], [], []>} : vector<1x120xbf16>, vector<120x84xbf16>, vector<1x84xf32> -> vector<1x84xf32>
    %c0_32 = arith.constant 0 : index
    %c0_33 = arith.constant 0 : index
    %58 = vector.load %arg13[%c0_32, %c0_33] : memref<1x84xf32, #tpu.memory_space<vmem>>, vector<1x84xf32>
    %59 = arith.addf %57, %58 : vector<1x84xf32>
    %cst_34 = arith.constant 0.000000e+00 : f32
    %60 = vector.broadcast %cst_34 : f32 to vector<1x84xf32>
    %61 = arith.maximumf %59, %60 : vector<1x84xf32>
    %62 = arith.truncf %61 : vector<1x84xf32> to vector<1x84xbf16>
    %c0_35 = arith.constant 0 : index
    %c0_36 = arith.constant 0 : index
    %63 = vector.load %arg14[%c0_35, %c0_36] : memref<84x128xbf16, #tpu.memory_space<vmem>>, vector<84x128xbf16>
    %cst_37 = arith.constant dense<0.000000e+00> : vector<1x128xf32>
    %64 = tpu.matmul %62, %63, %cst_37 {dimension_numbers = #tpu.dot_dimension_numbers<[1], [0], [0], [1], [0, 0, 1, 1], [], []>} : vector<1x84xbf16>, vector<84x128xbf16>, vector<1x128xf32> -> vector<1x128xf32>
    %c0_38 = arith.constant 0 : index
    %c0_39 = arith.constant 0 : index
    %65 = vector.load %arg15[%c0_38, %c0_39] : memref<1x128xf32, #tpu.memory_space<vmem>>, vector<1x128xf32>
    %66 = arith.addf %64, %65 : vector<1x128xf32>
    %c0_40 = arith.constant 0 : index
    %c0_41 = arith.constant 0 : index
    %c0_42 = arith.constant 0 : index
    %67 = vector.load %arg16[%c0_40, %c0_41, %c0_42] : memref<1x1x128xf32, #tpu.memory_space<vmem>>, vector<1x1x128xf32>
    %68 = vector.shape_cast %67 : vector<1x1x128xf32> to vector<1x128xf32>
    %69 = vector.shape_cast %66 : vector<1x128xf32> to vector<1x1x128xf32>
    tpu.vector_store %arg16[%c0_40, %c0_41, %c0_42], %69 {strides = array<i32>} : memref<1x1x128xf32, #tpu.memory_space<vmem>>, vector<1x1x128xf32>,
    return
  }
  func.func @transform_0(%arg0: i32) -> (i32, i32, i32) {
    %c0_i32 = arith.constant 0 : i32
    %c0_i32_0 = arith.constant 0 : i32
    %c0_i32_1 = arith.constant 0 : i32
    return %arg0, %c0_i32, %c0_i32_0 : i32, i32, i32
  }
  func.func @transform_1(%arg0: i32) -> (i32, i32) {
    %c0_i32 = arith.constant 0 : i32
    %c0_i32_0 = arith.constant 0 : i32
    %c0_i32_1 = arith.constant 0 : i32
    return %c0_i32, %c0_i32_0 : i32, i32
  }
  func.func @transform_2(%arg0: i32) -> (i32, i32) {
    %c0_i32 = arith.constant 0 : i32
    %c0_i32_0 = arith.constant 0 : i32
    %c0_i32_1 = arith.constant 0 : i32
    return %c0_i32, %c0_i32_0 : i32, i32
  }
  func.func @transform_3(%arg0: i32) -> (i32, i32) {
    %c0_i32 = arith.constant 0 : i32
    %c0_i32_0 = arith.constant 0 : i32
    %c0_i32_1 = arith.constant 0 : i32
    return %c0_i32, %c0_i32_0 : i32, i32
  }
  func.func @transform_4(%arg0: i32) -> (i32, i32) {
    %c0_i32 = arith.constant 0 : i32
    %c0_i32_0 = arith.constant 0 : i32
    %c0_i32_1 = arith.constant 0 : i32
    return %c0_i32, %c0_i32_0 : i32, i32
  }
  func.func @transform_5(%arg0: i32) -> (i32, i32) {
    %c0_i32 = arith.constant 0 : i32
    %c0_i32_0 = arith.constant 0 : i32
    %c0_i32_1 = arith.constant 0 : i32
    return %c0_i32, %c0_i32_0 : i32, i32
  }
  func.func @transform_6(%arg0: i32) -> (i32, i32) {
    %c0_i32 = arith.constant 0 : i32
    %c0_i32_0 = arith.constant 0 : i32
    %c0_i32_1 = arith.constant 0 : i32
    return %c0_i32, %c0_i32_0 : i32, i32
  }
  func.func @transform_7(%arg0: i32) -> (i32, i32) {
    %c0_i32 = arith.constant 0 : i32
    %c0_i32_0 = arith.constant 0 : i32
    %c0_i32_1 = arith.constant 0 : i32
    return %c0_i32, %c0_i32_0 : i32, i32
  }
  func.func @transform_8(%arg0: i32) -> (i32, i32) {
    %c0_i32 = arith.constant 0 : i32
    %c0_i32_0 = arith.constant 0 : i32
    %c0_i32_1 = arith.constant 0 : i32
    return %c0_i32, %c0_i32_0 : i32, i32
  }
  func.func @transform_9(%arg0: i32) -> (i32, i32) {
    %c0_i32 = arith.constant 0 : i32
    %c0_i32_0 = arith.constant 0 : i32
    %c0_i32_1 = arith.constant 0 : i32
    return %c0_i32, %c0_i32_0 : i32, i32
  }
  func.func @transform_10(%arg0: i32) -> (i32, i32) {
    %c0_i32 = arith.constant 0 : i32
    %c0_i32_0 = arith.constant 0 : i32
    %c0_i32_1 = arith.constant 0 : i32
    return %c0_i32, %c0_i32_0 : i32, i32
  }
  func.func @transform_11(%arg0: i32) -> (i32, i32) {
    %c0_i32 = arith.constant 0 : i32
    %c0_i32_0 = arith.constant 0 : i32
    %c0_i32_1 = arith.constant 0 : i32
    return %c0_i32, %c0_i32_0 : i32, i32
  }
  func.func @transform_12(%arg0: i32) -> (i32, i32) {
    %c0_i32 = arith.constant 0 : i32
    %c0_i32_0 = arith.constant 0 : i32
    %c0_i32_1 = arith.constant 0 : i32
    return %c0_i32, %c0_i32_0 : i32, i32
  }
  func.func @transform_13(%arg0: i32) -> (i32, i32) {
    %c0_i32 = arith.constant 0 : i32
    %c0_i32_0 = arith.constant 0 : i32
    %c0_i32_1 = arith.constant 0 : i32
    return %c0_i32, %c0_i32_0 : i32, i32
  }
  func.func @transform_14(%arg0: i32) -> (i32, i32) {
    %c0_i32 = arith.constant 0 : i32
    %c0_i32_0 = arith.constant 0 : i32
    %c0_i32_1 = arith.constant 0 : i32
    return %c0_i32, %c0_i32_0 : i32, i32
  }
  func.func @transform_15(%arg0: i32) -> (i32, i32, i32) {
    %c0_i32 = arith.constant 0 : i32
    %c0_i32_0 = arith.constant 0 : i32
    %c0_i32_1 = arith.constant 0 : i32
    return %arg0, %c0_i32, %c0_i32_0 : i32, i32, i32
  }
}

</mosaic_0001>

<bundles_post_ra>
// kernel: lenet_forward.1
= control target key start
LH: loop header
LB: loop body
LE: loop exit
PB: predicated region body
PF: predicated region fallthrough
CT: control target
= control target key end

     0   :  { %s5748_s0 = inlined_call_operand.vmem [shape: f32[2,32,128], index: 0, kind: input, shape index: {}]   ;;  %s5749_s1 = inlined_call_operand.vmem [shape: bf16[640,256], index: 1, kind: input, shape index: {}]   ;;  %s5750_s2 = inlined_call_operand.vmem [shape: f32[14,28], index: 2, kind: input, shape index: {}]   ;;  %s5751_s3 = inlined_call_operand.vmem [shape: f32[14,28], index: 3, kind: input, shape index: {}]   ;;  %s5752_s4 = inlined_call_operand.vmem [shape: f32[1,128], index: 4, kind: input, shape index: {}]   ;;  %s5753_s5 = inlined_call_operand.vmem [shape: bf16[640,256], index: 5, kind: input, shape index: {}]   ;;  %s5754_s6 = inlined_call_operand.vmem [shape: f32[5,10], index: 6, kind: input, shape index: {}]   ;;  %s5755_s7 = inlined_call_operand.hbm [shape: f32[5,10], index: 7, kind: input, shape index: {}]   ;;  %s5756_s8 = inlined_call_operand.hbm [shape: f32[1,128], index: 8, kind: input, shape index: {}]   ;;  %s5757_s9 = inlined_call_operand.vmem [shape: bf16[640,120], index: 9, kind: input, shape index: {}]   ;;  %s5758_s10 = inlined_call_operand.hbm [shape: f32[1,120], index: 10, kind: input, shape index: {}]   ;;  %s5759_s11 = inlined_call_operand.vmem [shape: bf16[120,84], index: 11, kind: input, shape index: {}]   ;;  %s5760_s12 = inlined_call_operand.hbm [shape: f32[1,84], index: 12, kind: input, shape index: {}]   ;;  %s5761_s13 = inlined_call_operand.hbm [shape: bf16[84,128], index: 13, kind: input, shape index: {}]   ;;  %s5762_s14 = inlined_call_operand.hbm [shape: f32[1,128], index: 14, kind: input, shape index: {}]   ;;  %s5763_s15 = inlined_call_operand.hbm [shape: f32[2,1,128], index: 15, kind: output, shape index: {}]  }
   0x1   :  { %5772 = sst [smem:[#allocation26_spill]] %s5755_s7 }
   0x2   :  { %5773 = sst [smem:[#allocation27_spill]] %s5756_s8 }
   0x3   :  { %5774 = sst [smem:[#allocation28_spill]] %s5760_s12 }
   0x4   :  { %20 = vsyncpa [#allocation3], 0 }
   0x5   :  { %21 = vsyncpa [#allocation6], 0 }
   0x6   :  { %22 = vsyncpa [#allocation9], 0 }
   0x7   :  { %23 = vsyncpa [#allocation12], 0 }
   0x8   :  { %24 = vsyncpa [#allocation4], 0 }
   0x9   :  { %26 = vsyncpa [#allocation4 + $0x1], 0  ;;  %s4329_s18 = smov 0   ;;  %s4331_s19 = smov 0  }
   0xa   :  { %s4333_s20 = smov 0   ;;  %s4335_s21 = smov 0  }
   0xb LB: > { %5775 = sst [smem:[#allocation19_spill]] %s4227_s18  ;;  %s4350_s22 = sadd.s32 4294967295, %s4239_s21   ;;  %s4239_s21 = sphi %s4335_s21, %s5793_s21   ;;  %s4235_s20 = sphi %s4333_s20, %s5795_s20   ;;  %s4231_s19 = sphi %s4331_s19, %s5797_s19   ;;  %s4227_s18 = sphi %s4329_s18, %s5796_s18  }
   0xc   : > { %5776 = sst [smem:[#allocation20_spill]] %s4235_s20  ;;  %s2784_s23 = sadd.s32 4294967294, %s4239_s21  }
   0xd   : > { %5777 = sst [smem:[#allocation21_spill]] %s4239_s21  ;;  %s4354_s24 = sadd.s32 1, %s4239_s21  }
   0xe   : > { %5778 = sst [smem:[#allocation22_spill]] %s4354_s24  ;;  %s359_s25 = sadd.s32 1, %s4235_s20 }
   0xf   : > { %s356_s26 = ssub.s32 %s4239_s21, %s4354_s24  ;;  %p369_p0 = scmp.ne.s32.totalorder %s4235_s20, %s4231_s19 }
  0x10   : > { %p357_p1 = scmp.eq.s32.totalorder %s356_s26, 0  ;;  %p370_p2 = scmp.eq.s32.totalorder %s4350_s22, 1 }
  0x11   : > { %p375_p3 = scmp.ne.s32.totalorder %s4231_s19, %s4227_s18  ;;  %p376_p4 = scmp.eq.s32.totalorder %s2784_s23, 1 }
  0x12   : > { %s4365_s27 = scalar_select %p357_p1, %s4235_s20, %s359_s25  }
  0x13   : > { %p4367_p5 = por %p370_p2, %p369_p0  ;;  %p4371_p6 = por %p376_p4, %p375_p3 }
  0x14   : > { %5779 = sst [smem:[#allocation23_spill]] %s4365_s27  ;;  %p2785_p7 = scmp.ge.s32.totalorder %s4239_s21, 1 }
  0x15   : > { %s5780_s28 = scalar_select %p4367_p5, 1, 0 }
  0x16   : > { %s5782_s29 = scalar_select %p4371_p6, 1, 0 }
  0x17   : > { %5781 = sst [smem:[#allocation24_spill]] %s5780_s28  ;;  %p383_p8 = scmp.lt.s32.totalorder %s4239_s21, 3 }
  0x18   : > { %5783 = sst [smem:[#allocation25_spill]] %s5782_s29  ;;  %p3926_p9 = scmp.eq.s32.totalorder %s4350_s22, 0 }
  0x19   : > { %p4378_p10 = pnand %p2785_p7, %p383_p8  ;;  %s5785_s8 = sld [smem:[#allocation27_spill]] }
  0x1a   : > { %s4241_s25 = smov [#allocation5]   ;;  %s5786_s12 = sld [smem:[#allocation28_spill]] }
  0x1b   : > { %p3903_p11 = pneg %p4378_p10  ;;  %s427_s26 = sshll.u32 %s4241_s25, 4  ;;  %s428_s26 = int_to_ptr.vmem [resolvable:$true] %s427_s26 }
  0x1c   : > { %s5788_s7 = sld [smem:[#allocation26_spill]]  ;;  %s4242_s18 = smov [#allocation8]  }
  0x1d   : > { %p4392_p12 = pnand %p3926_p9, %p3903_p11  ;;  %s457_s25 = sshll.u32 %s4242_s18, 4  ;;  %s458_s25 = int_to_ptr.vmem [resolvable:$true] %s457_s25 }
  0x1e   : > { %s4243_s21 = smov [#allocation2]   ;;  %s4244_s16 = smov [#allocation7]  }
  0x1f   : > { %s425_s23 = sshll.u32 %s5785_s8, 4  ;;  %s415_s28 = sshll.u32 %s4243_s21, 4  ;;  %s426_s23 = int_to_ptr.hbm [resolvable:$true] %s425_s23  ;;  %s416_s28 = int_to_ptr.vmem [resolvable:$true] %s415_s28 }
  0x20   : > { %s455_s24 = sshll.u32 %s5786_s12, 4  ;;  %s440_s12 = sshll.u32 %s5758_s10, 4  ;;  %s456_s24 = int_to_ptr.hbm [resolvable:$true] %s455_s24  ;;  %s441_s12 = int_to_ptr.hbm [resolvable:$true] %s440_s12 }
  0x21   : > { %3909 = dma.hbm_to_vmem [thread:$0]  (!%p4392_p12), %s426_s23, 16, %s428_s26, [#allocation6]  }
  0x22   : > { %s413_s8 = sshll.u32 %s5788_s7, 4  ;;  %s442_s18 = sshll.u32 %s4244_s16, 4  ;;  %s414_s8 = int_to_ptr.hbm [resolvable:$true] %s413_s8  ;;  %s443_s18 = int_to_ptr.vmem [resolvable:$true] %s442_s18 }
  0x23   : > { %3915 = dma.hbm_to_vmem [thread:$0]  (!%p4392_p12), %s456_s24, 16, %s458_s25, [#allocation9]  }
  0x24   : > { %3906 = dma.hbm_to_vmem [thread:$0]  (!%p4392_p12), %s414_s8, 128, %s416_s28, [#allocation3]  }
  0x25   : > { %s466_s23 = sshll.u32 %s5761_s13, 4  ;;  %s4245_s24 = smov [#allocation10]   ;;  %s467_s23 = int_to_ptr.hbm [resolvable:$true] %s466_s23 }
  0x26   : > { %3912 = dma.hbm_to_vmem [thread:$0]  (!%p4392_p12), %s441_s12, 16, %s443_s18, [#allocation6]  }
  0x27   : > { %s468_s26 = sshll.u32 %s4245_s24, 4  ;;  %s481_s20 = sshll.u32 %s5762_s14, 4  ;;  %s469_s26 = int_to_ptr.vmem [resolvable:$true] %s468_s26  ;;  %s482_s20 = int_to_ptr.hbm [resolvable:$true] %s481_s20 }
  0x28   : > { %s4246_s27 = smov 64   ;;  %s4247_s8 = smov 4  }
  0x29   : > { %3918 = dma.hbm_to_vmem [thread:$0]  (!%p4392_p12), %s467_s23, 704, %s469_s26, [#allocation9], %s4246_s27, %s4246_s27, %s4247_s8  }
  0x2a   : > { %s4248_s28 = smov [#allocation11]   ;;  %504 = sbr.rel (%p4378_p10) target bundleno = 1202 (0x4b2), region = 80 }
  0x2b   : > { %s483_s7 = sshll.u32 %s4248_s28, 4  ;;  %s484_s7 = int_to_ptr.vmem [resolvable:$true] %s483_s7 }
  0x2c   : > { %3921 = dma.hbm_to_vmem [thread:$0]  (!%p4392_p12), %s482_s20, 16, %s484_s7, [#allocation12]  }
  0x2f   : > { %4206 = dma.done.wait (%p3926_p9), [#allocation3], 128  }
  0x30   : > { %4208 = vsyncadd (%p3926_p9), [#allocation3], 4294967168 }
  0x31   : > { %4210 = dma.done.wait (%p3926_p9), [#allocation6], 32  }
  0x32   : > { %4212 = vsyncadd (%p3926_p9), [#allocation6], 4294967264 }
  0x33   : > { %4214 = dma.done.wait (%p3926_p9), [#allocation9], 720  }
  0x34   : > { %4216 = vsyncadd (%p3926_p9), [#allocation9], 4294966576 }
  0x35   : > { %4218 = dma.done.wait (%p3926_p9), [#allocation12], 16  }
  0x36   : > { %4220 = vsyncadd (%p3926_p9), [#allocation12], 4294967280  ;;  %p577_p13 = scmp.lt.s32.totalorder %s4350_s22, 1  ;;  %v2860_v0 = vld [vmem:[%s5749_s1 + $0x70] sm:$0xf]  ;;  %vm591_vm0 = vcmask 1046528   ;;  %s2665_s20 = scalar_lea.hbm %s5763_s15, %s4350_s22 }
  0x37   : > { %v3680_v1 = vld [vmem:[%s5749_s1 + $0x74] sm:$0xf0]  ;;  %v2924_v2 = vld [vmem:[%s5749_s1 + $0xf0] sm:$0xf]  ;;  %v2852_v11 = vld [vmem:[%s5749_s1 + $0x60] sm:$0xf] }
  0x38   : > { %v2861_v3 = vor.u32 %v3680_v1, %v2860_v0  ;;  %v3696_v4 = vld [vmem:[%s5749_s1 + $0xf4] sm:$0xf0]  ;;  %v2988_v5 = vld [vmem:[%s5749_s1 + $0x170] sm:$0xf]  ;;  %v3678_v13 = vld [vmem:[%s5749_s1 + $0x64] sm:$0xf0] }
  0x39   : > { %v3712_v6 = vld [vmem:[%s5749_s1 + $0x174] sm:$0xf0]  ;;  %v2925_v7 = vor.u32 %v3696_v4, %v2924_v2  ;;  %v3052_v9 = vld [vmem:[%s5749_s1 + $0x1f0] sm:$0xf]  ;;  %v2916_v14 = vld [vmem:[%s5749_s1 + $0xe0] sm:$0xf]  ;;  %v2853_v16 = vor.u32 %v3678_v13, %v2852_v11 }
  0x3a   : > { %v2989_v8 = vor.u32 %v3712_v6, %v2988_v5  ;;  %v3728_v10 = vld [vmem:[%s5749_s1 + $0x1f4] sm:$0xf0]  ;;  %1129 = vmatpush.bf16.msra.mxu0 %v2861_v3  ;;  %v3694_v15 = vld [vmem:[%s5749_s1 + $0xe4] sm:$0xf0]  ;;  %v2980_v18 = vld [vmem:[%s5749_s1 + $0x160] sm:$0xf] }
  0x3b   : > { %v3053_v12 = vor.u32 %v3728_v10, %v3052_v9  ;;  %1148 = vmatpush.bf16.msra.mxu1 %v2925_v7  ;;  %v2917_v17 = vor.u32 %v3694_v15, %v2916_v14  ;;  %v3710_v19 = vld [vmem:[%s5749_s1 + $0x164] sm:$0xf0]  ;;  %v3044_v20 = vld [vmem:[%s5749_s1 + $0x1e0] sm:$0xf]  ;;  %v2844_v23 = vld [vmem:[%s5749_s1 + $0x50] sm:$0xf] }
  0x3c   : > { %1167 = vmatpush.bf16.msra.mxu2 %v2989_v8  ;;  %v2981_v21 = vor.u32 %v3710_v19, %v2980_v18  ;;  %v3726_v22 = vld [vmem:[%s5749_s1 + $0x1e4] sm:$0xf0]  ;;  %v3676_v24 = vld [vmem:[%s5749_s1 + $0x54] sm:$0xf0]  ;;  %v2908_v26 = vld [vmem:[%s5749_s1 + $0xd0] sm:$0xf] }
  0x3d   : > { %1186 = vmatpush.bf16.msra.mxu3 %v3053_v12  ;;  %v3045_v25 = vor.u32 %v3726_v22, %v3044_v20  ;;  %v3692_v27 = vld [vmem:[%s5749_s1 + $0xd4] sm:$0xf0]  ;;  %v2972_v28 = vld [vmem:[%s5749_s1 + $0x150] sm:$0xf]  ;;  %v2845_v29 = vor.u32 %v3676_v24, %v2844_v23  ;;  %v2836_v35 = vld [vmem:[%s5749_s1 + $0x40] sm:$0xf] }
  0x3e   : > { %1130 = vmatpush.bf16.msra.mxu0 %v2853_v16  ;;  %v3708_v30 = vld [vmem:[%s5749_s1 + $0x154] sm:$0xf0]  ;;  %v3036_v31 = vld [vmem:[%s5749_s1 + $0x1d0] sm:$0xf]  ;;  %v2909_v33 = vor.u32 %v3692_v27, %v2908_v26  ;;  %v3674_v36 = vld [vmem:[%s5749_s1 + $0x44] sm:$0xf0] }
  0x3f   : > { %v3724_v32 = vld [vmem:[%s5749_s1 + $0x1d4] sm:$0xf0]  ;;  %1149 = vmatpush.bf16.msra.mxu1 %v2917_v17  ;;  %v2973_v34 = vor.u32 %v3708_v30, %v2972_v28  ;;  %v2900_v37 = vld [vmem:[%s5749_s1 + $0xc0] sm:$0xf]  ;;  %v3690_v39 = vld [vmem:[%s5749_s1 + $0xc4] sm:$0xf0]  ;;  %v2837_v44 = vor.u32 %v3674_v36, %v2836_v35 }
  0x40   : > { %1168 = vmatpush.bf16.msra.mxu2 %v2981_v21  ;;  %v3037_v38 = vor.u32 %v3724_v32, %v3036_v31  ;;  %v2964_v40 = vld [vmem:[%s5749_s1 + $0x140] sm:$0xf]  ;;  %v3706_v41 = vld [vmem:[%s5749_s1 + $0x144] sm:$0xf0]  ;;  %s4538_s12 = scalar_select %p577_p13, %s4350_s22, 1  ;;  %v2901_v45 = vor.u32 %v3690_v39, %v2900_v37  ;;  %vm603_vm1 = vcmask 1045504  }
  0x41   : > { %1187 = vmatpush.bf16.msra.mxu3 %v3045_v25  ;;  %v3028_v42 = vld [vmem:[%s5749_s1 + $0x1c0] sm:$0xf]  ;;  %v3722_v43 = vld [vmem:[%s5749_s1 + $0x1c4] sm:$0xf0]  ;;  %v2965_v46 = vor.u32 %v3706_v41, %v2964_v40  ;;  %v2828_v47 = vld [vmem:[%s5749_s1 + $0x30] sm:$0xf] }
  0x42   : > { %1131 = vmatpush.bf16.msra.mxu0 %v2845_v29  ;;  %v3672_v48 = vld [vmem:[%s5749_s1 + $0x34] sm:$0xf0]  ;;  %v2892_v49 = vld [vmem:[%s5749_s1 + $0xb0] sm:$0xf]  ;;  %v3029_v50 = vor.u32 %v3722_v43, %v3028_v42  ;;  %v2820_v57 = vld [vmem:[%s5749_s1 + $0x20] sm:$0xf] }
  0x43   : > { %1150 = vmatpush.bf16.msra.mxu1 %v2909_v33  ;;  %v3688_v51 = vld [vmem:[%s5749_s1 + $0xb4] sm:$0xf0]  ;;  %v2956_v52 = vld [vmem:[%s5749_s1 + $0x130] sm:$0xf]  ;;  %v2829_v56 = vor.u32 %v3672_v48, %v2828_v47  ;;  %s3664_s18 = sshll.u32 %s4538_s12, 5  ;;  %vm615_vm2 = vcmask 1044480  }
  0x44   : > { %1169 = vmatpush.bf16.msra.mxu2 %v2973_v34  ;;  %v3704_v53 = vld [vmem:[%s5749_s1 + $0x134] sm:$0xf0]  ;;  %v3020_v54 = vld [vmem:[%s5749_s1 + $0x1b0] sm:$0xf]  ;;  %v2893_v58 = vor.u32 %v3688_v51, %v2892_v49  ;;  %v3670_v60 = vld [vmem:[%s5749_s1 + $0x24] sm:$0xf0]  ;;  %s4598_s25 = scalar_lea.vmem %s5748_s0, %s3664_s18 }
  0x45   : > { %1188 = vmatpush.bf16.msra.mxu3 %v3037_v38  ;;  %v3720_v55 = vld [vmem:[%s5749_s1 + $0x1b4] sm:$0xf0]  ;;  %v2957_v59 = vor.u32 %v3704_v53, %v2956_v52  ;;  %v2884_v61 = vld [vmem:[%s5749_s1 + $0xa0] sm:$0xf]  ;;  %v3686_v62 = vld [vmem:[%s5749_s1 + $0xa4] sm:$0xf0]  ;;  %v2821_v6 = vor.u32 %v3670_v60, %v2820_v57 }
  0x46   : > { %1132 = vmatpush.bf16.msra.mxu0 %v2837_v44  ;;  %v3021_v63 = vor.u32 %v3720_v55, %v3020_v54  ;;  %v2948_v0 = vld [vmem:[%s5749_s1 + $0x120] sm:$0xf]  ;;  %v3702_v1 = vld [vmem:[%s5749_s1 + $0x124] sm:$0xf0]  ;;  %v2812_v4 = vld [vmem:[%s5749_s1 + $0x10] sm:$0xf]  ;;  %v2885_v10 = vor.u32 %v3686_v62, %v2884_v61 }
  0x47   : > { %1151 = vmatpush.bf16.msra.mxu1 %v2901_v45  ;;  %v3012_v2 = vld [vmem:[%s5749_s1 + $0x1a0] sm:$0xf]  ;;  %v3718_v3 = vld [vmem:[%s5749_s1 + $0x1a4] sm:$0xf0]  ;;  %v3668_v5 = vld [vmem:[%s5749_s1 + $0x14] sm:$0xf0]  ;;  %v2949_v11 = vor.u32 %v3702_v1, %v2948_v0 }
  0x48   : > { %1170 = vmatpush.bf16.msra.mxu2 %v2965_v46  ;;  %v2876_v7 = vld [vmem:[%s5749_s1 + $0x90] sm:$0xf]  ;;  %v3684_v8 = vld [vmem:[%s5749_s1 + $0x94] sm:$0xf0]  ;;  %v3013_v15 = vor.u32 %v3718_v3, %v3012_v2  ;;  %v2804_v16 = vld [vmem:[%s5749_s1] sm:$0xf]  ;;  %v2813_v19 = vor.u32 %v3668_v5, %v2812_v4 }
  0x49   : > { %1189 = vmatpush.bf16.msra.mxu3 %v3029_v50  ;;  %v2940_v9 = vld [vmem:[%s5749_s1 + $0x110] sm:$0xf]  ;;  %v3700_v12 = vld [vmem:[%s5749_s1 + $0x114] sm:$0xf0]  ;;  %v4622_v17 = vld [vmem:[%s4598_s25] sm:$0xff]  ;;  %v2877_v23 = vor.u32 %v3684_v8, %v2876_v7  ;;  %vm627_vm3 = vcmask 1043456  }
  0x4a   : > { %1133 = vmatpush.bf16.msra.mxu0 %v2829_v56  ;;  %v3004_v13 = vld [vmem:[%s5749_s1 + $0x190] sm:$0xf]  ;;  %v3716_v14 = vld [vmem:[%s5749_s1 + $0x194] sm:$0xf0]  ;;  %v4625_v18 = vld [vmem:[%s4598_s25 + $0x8] sm:$0xff]  ;;  %v2941_v24 = vor.u32 %v3700_v12, %v2940_v9  ;;  %v592_v27 = vrot.slane %v4622_v17, 1 }
  0x4b   : > { %1152 = vmatpush.bf16.msra.mxu1 %v2893_v58  ;;  %v3666_v20 = vld [vmem:[%s5749_s1 + $0x4] sm:$0xf0]  ;;  %v2868_v21 = vld [vmem:[%s5749_s1 + $0x80] sm:$0xf]  ;;  %v4634_v22 = vld [vmem:[%s4598_s25 + $0x10] sm:$0xff]  ;;  %v593_v28 = vrot.slane %v4625_v18, 1  ;;  %v3005_v34 = vor.u32 %v3716_v14, %v3004_v13  ;;  %v4695_v58 = vpack.c.bf16 %v4625_v18, %v4622_v17 }
  0x4c   : > { %1171 = vmatpush.bf16.msra.mxu2 %v2957_v59  ;;  %v3682_v25 = vld [vmem:[%s5749_s1 + $0x84] sm:$0xf0]  ;;  %v2932_v26 = vld [vmem:[%s5749_s1 + $0x100] sm:$0xf]  ;;  %v595_v30 = vrot.slane %v4634_v22, 1  ;;  %v604_v31 = vrot.slane %v4622_v17, 2  ;;  %v2805_v37 = vor.u32 %v3666_v20, %v2804_v16 }
  0x4d   : > { %1190 = vmatpush.bf16.msra.mxu3 %v3021_v63  ;;  %v3698_v29 = vld [vmem:[%s5749_s1 + $0x104] sm:$0xf0]  ;;  %v605_v32 = vrot.slane %v4625_v18, 2  ;;  %v607_v33 = vrot.slane %v4634_v22, 2  ;;  %v2996_v35 = vld [vmem:[%s5749_s1 + $0x180] sm:$0xf]  ;;  %v2869_v38 = vor.u32 %v3682_v25, %v2868_v21  ;;  %v594_v43 = vsel %vm591_vm0, %v592_v27, %v593_v28 }
  0x4e   : > { %1134 = vmatpush.bf16.msra.mxu0 %v2821_v6  ;;  %v3714_v36 = vld [vmem:[%s5749_s1 + $0x184] sm:$0xf0]  ;;  %v3116_v39 = vld [vmem:[%s5749_s1 + $0x270] sm:$0xf]  ;;  %v3744_v40 = vld [vmem:[%s5749_s1 + $0x274] sm:$0xf0]  ;;  %v2933_v42 = vor.u32 %v3698_v29, %v2932_v26  ;;  %v596_v48 = vsel %vm591_vm0, %v593_v28, %v595_v30 }
  0x4f   : > { %1153 = vmatpush.bf16.msra.mxu1 %v2885_v10  ;;  %v616_v41 = vrot.slane %v4622_v17, 3  ;;  %v3679_v44 = vld [vmem:[%s5749_s1 + $0x74] sm:$0xf]  ;;  %v2862_v45 = vld [vmem:[%s5749_s1 + $0x78] sm:$0xf0]  ;;  %v617_v46 = vrot.slane %v4625_v18, 3  ;;  %v606_v49 = vsel %vm603_vm1, %v604_v31, %v605_v32  ;;  %v608_v50 = vsel %vm603_vm1, %v605_v32, %v607_v33 }
  0x50   : > { %1172 = vmatpush.bf16.msra.mxu2 %v2949_v11  ;;  %v619_v47 = vrot.slane %v4634_v22, 3  ;;  %v2997_v51 = vor.u32 %v3714_v36, %v2996_v35  ;;  %v3117_v52 = vor.u32 %v3744_v40, %v3116_v39  ;;  %v3695_v53 = vld [vmem:[%s5749_s1 + $0xf4] sm:$0xf]  ;;  %v2926_v54 = vld [vmem:[%s5749_s1 + $0xf8] sm:$0xf0]  ;;  %v2865_v59 = vor.u32 %v3679_v44, %v2862_v45  ;;  %s575_s24 = sand.u32 1, %s4231_s19  }
  0x51   : > { %1191 = vmatpush.bf16.msra.mxu3 %v3013_v15  ;;  %v618_v55 = vsel %vm615_vm2, %v616_v41, %v617_v46  ;;  %v3711_v57 = vld [vmem:[%s5749_s1 + $0x174] sm:$0xf]  ;;  %v2990_v60 = vld [vmem:[%s5749_s1 + $0x178] sm:$0xf0]  ;;  %v3108_v61 = vld [vmem:[%s5749_s1 + $0x260] sm:$0xf]  ;;  %v4706_v63 = vpack.c.bf16 %v596_v48, %v594_v43  ;;  %v4708_v0 = vpack.c.bf16 %v608_v50, %v606_v49  ;;  %v2929_v3 = vor.u32 %v3695_v53, %v2926_v54 }
  0x52   : > { %1135 = vmatpush.bf16.msra.mxu0 %v2813_v19  ;;  %v620_v56 = vsel %vm615_vm2, %v617_v46, %v619_v47  ;;  %v3742_v62 = vld [vmem:[%s5749_s1 + $0x264] sm:$0xf0]  ;;  %v3677_v1 = vld [vmem:[%s5749_s1 + $0x64] sm:$0xf]  ;;  %v2854_v2 = vld [vmem:[%s5749_s1 + $0x68] sm:$0xf0]  ;;  %v2993_v5 = vor.u32 %v3711_v57, %v2990_v60 }
  0x53   : > { %1154 = vmatpush.bf16.msra.mxu1 %v2877_v23  ;;  %v4716_v4 = vpack.c.bf16 %v620_v56, %v618_v55  ;;  %v3109_v6 = vor.u32 %v3742_v62, %v3108_v61  ;;  %v3693_v7 = vld [vmem:[%s5749_s1 + $0xe4] sm:$0xf]  ;;  %v2918_v8 = vld [vmem:[%s5749_s1 + $0xe8] sm:$0xf0]  ;;  %v2857_v10 = vor.u32 %v3677_v1, %v2854_v2  ;;  %v3100_v12 = vld [vmem:[%s5749_s1 + $0x250] sm:$0xf] }
  0x54   : > { %1173 = vmatpush.bf16.msra.mxu2 %v2941_v24  ;;  %v3709_v9 = vld [vmem:[%s5749_s1 + $0x164] sm:$0xf]  ;;  %v2982_v11 = vld [vmem:[%s5749_s1 + $0x168] sm:$0xf0]  ;;  %v3740_v13 = vld [vmem:[%s5749_s1 + $0x254] sm:$0xf0]  ;;  %v2921_v16 = vor.u32 %v3693_v7, %v2918_v8 }
  0x55   : > { %1192 = vmatpush.bf16.msra.mxu3 %v3005_v34  ;;  %v3675_v14 = vld [vmem:[%s5749_s1 + $0x54] sm:$0xf]  ;;  %v2846_v15 = vld [vmem:[%s5749_s1 + $0x58] sm:$0xf0]  ;;  %v2985_v20 = vor.u32 %v3709_v9, %v2982_v11  ;;  %v3101_v21 = vor.u32 %v3740_v13, %v3100_v12  ;;  %v3092_v28 = vld [vmem:[%s5749_s1 + $0x240] sm:$0xf] }
  0x56   : > { %1136 = vmatpush.bf16.msra.mxu0 %v2805_v37  ;;  %v4747_v19 = vld [vmem:[%s4598_s25 + $0x18] sm:$0xff]  ;;  %v3691_v23 = vld [vmem:[%s5749_s1 + $0xd4] sm:$0xf]  ;;  %v2849_v26 = vor.u32 %v3675_v14, %v2846_v15  ;;  %v3738_v29 = vld [vmem:[%s5749_s1 + $0x244] sm:$0xf0]  ;;  %vm1325_vm4 = vcmask 228352  }
  0x57   : > { %1155 = vmatpush.bf16.msra.mxu1 %v2869_v38  ;;  %v2910_v24 = vld [vmem:[%s5749_s1 + $0xd8] sm:$0xf0]  ;;  %v3707_v25 = vld [vmem:[%s5749_s1 + $0x154] sm:$0xf]  ;;  %v3673_v31 = vld [vmem:[%s5749_s1 + $0x44] sm:$0xf]  ;;  %v3093_v39 = vor.u32 %v3738_v29, %v3092_v28  ;;  %v4820_v57 = vpack.c.bf16 %v4747_v19, %v4634_v22 }
  0x58   : > { %1174 = vmatpush.bf16.msra.mxu2 %v2933_v42  ;;  %v2974_v27 = vld [vmem:[%s5749_s1 + $0x158] sm:$0xf0]  ;;  %v2838_v32 = vld [vmem:[%s5749_s1 + $0x48] sm:$0xf0]  ;;  %v2913_v34 = vor.u32 %v3691_v23, %v2910_v24  ;;  %v3689_v35 = vld [vmem:[%s5749_s1 + $0xc4] sm:$0xf] }
  0x59   : > { %1193 = vmatpush.bf16.msra.mxu3 %v2997_v51  ;;  %1137 = vmatmul.bf16.vlgmr.msra.gmra.mxu0 %v4695_v58  ;;  %v597_v36 = vrot.slane %v4747_v19, 1  ;;  %v609_v37 = vrot.slane %v4747_v19, 2  ;;  %v2977_v38 = vor.u32 %v3707_v25, %v2974_v27  ;;  %v2902_v40 = vld [vmem:[%s5749_s1 + $0xc8] sm:$0xf0]  ;;  %v3705_v41 = vld [vmem:[%s5749_s1 + $0x144] sm:$0xf]  ;;  %v2841_v43 = vor.u32 %v3673_v31, %v2838_v32 }
  0x5a   : > { %1205 = vmatpush.bf16.msrb.mxu0 %v3117_v52  ;;  %1156 = vmatmul.bf16.vlgmr.msra.gmra.mxu1 %v4706_v63  ;;  %v621_v42 = vrot.slane %v4747_v19, 3  ;;  %v2966_v44 = vld [vmem:[%s5749_s1 + $0x148] sm:$0xf0]  ;;  %v3084_v45 = vld [vmem:[%s5749_s1 + $0x230] sm:$0xf]  ;;  %v2905_v50 = vor.u32 %v3689_v35, %v2902_v40  ;;  %vm2051_vm5 = vcmask 1041408  }
  0x5b   : > { %1224 = vmatpush.bf16.msrb.mxu1 %v2865_v59  ;;  %1175 = vmatmul.bf16.vlgmr.msra.gmra.mxu2 %v4708_v0  ;;  %v3736_v46 = vld [vmem:[%s5749_s1 + $0x234] sm:$0xf0]  ;;  %v3671_v48 = vld [vmem:[%s5749_s1 + $0x34] sm:$0xf]  ;;  %v2830_v49 = vld [vmem:[%s5749_s1 + $0x38] sm:$0xf0]  ;;  %v598_v51 = vsel %vm591_vm0, %v595_v30, %v597_v36  ;;  %v610_v52 = vsel %vm603_vm1, %v607_v33, %v609_v37  ;;  %v2969_v53 = vor.u32 %v3705_v41, %v2966_v44 }
  0x5c   : > { %1243 = vmatpush.bf16.msrb.mxu2 %v2929_v3  ;;  %1194 = vmatmul.bf16.vlgmr.msra.gmra.mxu3 %v4716_v4  ;;  %v3085_v54 = vor.u32 %v3736_v46, %v3084_v45  ;;  %v3687_v55 = vld [vmem:[%s5749_s1 + $0xb4] sm:$0xf]  ;;  %v2894_v56 = vld [vmem:[%s5749_s1 + $0xb8] sm:$0xf0]  ;;  %v622_v30 = vsel %vm615_vm2, %v619_v47, %v621_v42  ;;  %v2833_v59 = vor.u32 %v3671_v48, %v2830_v49  ;;  %v3076_v61 = vld [vmem:[%s5749_s1 + $0x220] sm:$0xf] }
  0x5d   : > { %1262 = vmatpush.bf16.msrb.mxu3 %v2993_v5  ;;  %v3703_v33 = vld [vmem:[%s5749_s1 + $0x134] sm:$0xf]  ;;  %v2958_v60 = vld [vmem:[%s5749_s1 + $0x138] sm:$0xf0]  ;;  %v3734_v47 = vld [vmem:[%s5749_s1 + $0x224] sm:$0xf0]  ;;  %v4831_v62 = vpack.c.bf16 %v597_v36, %v598_v51  ;;  %v4833_v1 = vpack.c.bf16 %v609_v37, %v610_v52  ;;  %v2897_v5 = vor.u32 %v3687_v55, %v2894_v56 }
  0x5e   : > { %1206 = vmatpush.bf16.msrb.mxu0 %v3109_v6  ;;  %v3669_v2 = vld [vmem:[%s5749_s1 + $0x24] sm:$0xf]  ;;  %v2822_v3 = vld [vmem:[%s5749_s1 + $0x28] sm:$0xf0]  ;;  %v4841_v6 = vpack.c.bf16 %v621_v42, %v622_v30  ;;  %v2961_v7 = vor.u32 %v3703_v33, %v2958_v60  ;;  %v3077_v8 = vor.u32 %v3734_v47, %v3076_v61  ;;  %v3068_v14 = vld [vmem:[%s5749_s1 + $0x210] sm:$0xf] }
  0x5f   : > { %1225 = vmatpush.bf16.msrb.mxu1 %v2857_v10  ;;  %v3685_v9 = vld [vmem:[%s5749_s1 + $0xa4] sm:$0xf]  ;;  %v2886_v10 = vld [vmem:[%s5749_s1 + $0xa8] sm:$0xf0]  ;;  %v2825_v12 = vor.u32 %v3669_v2, %v2822_v3  ;;  %v3732_v15 = vld [vmem:[%s5749_s1 + $0x214] sm:$0xf0] }
  0x60   : > { %1244 = vmatpush.bf16.msrb.mxu2 %v2921_v16  ;;  %v3701_v11 = vld [vmem:[%s5749_s1 + $0x124] sm:$0xf]  ;;  %v2950_v13 = vld [vmem:[%s5749_s1 + $0x128] sm:$0xf0]  ;;  %v3667_v16 = vld [vmem:[%s5749_s1 + $0x14] sm:$0xf]  ;;  %v2889_v23 = vor.u32 %v3685_v9, %v2886_v10  ;;  %v3069_v28 = vor.u32 %v3732_v15, %v3068_v14 }
  0x61   : > { %1263 = vmatpush.bf16.msrb.mxu3 %v2985_v20  ;;  %v2814_v20 = vld [vmem:[%s5749_s1 + $0x18] sm:$0xf0]  ;;  %v3699_v25 = vld [vmem:[%s5749_s1 + $0x114] sm:$0xf]  ;;  %v2953_v27 = vor.u32 %v3701_v11, %v2950_v13  ;;  %v3060_v29 = vld [vmem:[%s5749_s1 + $0x200] sm:$0xf] }
  0x62   : > { %1207 = vmatpush.bf16.msrb.mxu0 %v3101_v21  ;;  %v3683_v21 = vld [vmem:[%s5749_s1 + $0x94] sm:$0xf]  ;;  %v2878_v24 = vld [vmem:[%s5749_s1 + $0x98] sm:$0xf0]  ;;  %v3730_v31 = vld [vmem:[%s5749_s1 + $0x204] sm:$0xf0] }
  0x63   : > { %1226 = vmatpush.bf16.msrb.mxu1 %v2849_v26  ;;  %v2942_v26 = vld [vmem:[%s5749_s1 + $0x118] sm:$0xf0]  ;;  %v3665_v32 = vld [vmem:[%s5749_s1 + $0x4] sm:$0xf]  ;;  %v2806_v35 = vld [vmem:[%s5749_s1 + $0x8] sm:$0xf0]  ;;  %v2881_v41 = vor.u32 %v3683_v21, %v2878_v24 }
  0x64   : > { %1245 = vmatpush.bf16.msrb.mxu2 %v2913_v34  ;;  %v2817_v34 = vor.u32 %v3667_v16, %v2814_v20  ;;  %v628_v36 = vrot.slane %v4622_v17, 4  ;;  %v3727_v37 = vld [vmem:[%s5749_s1 + $0x1f4] sm:$0xf]  ;;  %v3054_v40 = vld [vmem:[%s5749_s1 + $0x1f8] sm:$0xf0]  ;;  %v2809_v46 = vor.u32 %v3665_v32, %v2806_v35  ;;  %vm2047_vm6 = vcmask 80896  }
  0x65   : > { %1264 = vmatpush.bf16.msrb.mxu3 %v2977_v38  ;;  %v629_v38 = vrot.slane %v4625_v18, 4  ;;  %v3743_v42 = vld [vmem:[%s5749_s1 + $0x274] sm:$0xf]  ;;  %v3118_v17 = vld [vmem:[%s5749_s1 + $0x278] sm:$0xf0]  ;;  %v3061_v18 = vor.u32 %v3730_v31, %v3060_v29  ;;  %vm2568_vm7 = vcmask 982016  }
  0x66   : > { %1208 = vmatpush.bf16.msrb.mxu0 %v3093_v39  ;;  %v631_v39 = vrot.slane %v4634_v22, 4  ;;  %v3681_v44 = vld [vmem:[%s5749_s1 + $0x84] sm:$0xf]  ;;  %v2870_v45 = vld [vmem:[%s5749_s1 + $0x88] sm:$0xf0]  ;;  %vm2635_vm8 = vcmask 687104  }
  0x67   : > { %1227 = vmatpush.bf16.msrb.mxu1 %v2841_v43  ;;  %v2945_v43 = vor.u32 %v3699_v25, %v2942_v26  ;;  %v3697_v48 = vld [vmem:[%s5749_s1 + $0x104] sm:$0xf]  ;;  %v2934_v49 = vld [vmem:[%s5749_s1 + $0x108] sm:$0xf0]  ;;  %v630_v51 = vsel %vm627_vm3, %v628_v36, %v629_v38  ;;  %v3723_v2 = vld [vmem:[%s5749_s1 + $0x1d4] sm:$0xf] }
  0x68   : > { %1246 = vmatpush.bf16.msrb.mxu2 %v2905_v50  ;;  %v3057_v50 = vor.u32 %v3727_v37, %v3054_v40  ;;  %v632_v52 = vsel %vm627_vm3, %v629_v38, %v631_v39  ;;  %v2937_v55 = vor.u32 %v3697_v48, %v2934_v49  ;;  %v3725_v56 = vld [vmem:[%s5749_s1 + $0x1e4] sm:$0xf]  ;;  %v3046_v30 = vld [vmem:[%s5749_s1 + $0x1e8] sm:$0xf0]  ;;  %v3038_v3 = vld [vmem:[%s5749_s1 + $0x1d8] sm:$0xf0] }
  0x69   : > { %1265 = vmatpush.bf16.msrb.mxu3 %v2969_v53  ;;  %1142 = vmatmul.bf16.gmra.mxu0 %v4820_v57  ;;  %v3121_v53 = vor.u32 %v3743_v42, %v3118_v17  ;;  %v4932_v33 = vpack.c.bf16 %v632_v52, %v630_v51  ;;  %v3110_v60 = vld [vmem:[%s5749_s1 + $0x268] sm:$0xf0]  ;;  %v3049_v61 = vor.u32 %v3725_v56, %v3046_v30  ;;  %v3721_v10 = vld [vmem:[%s5749_s1 + $0x1c4] sm:$0xf]  ;;  %v3719_v14 = vld [vmem:[%s5749_s1 + $0x1b4] sm:$0xf] }
  0x6a   : > { %1209 = vmatpush.bf16.msrb.mxu0 %v3085_v54  ;;  %1161 = vmatmul.bf16.gmra.mxu1 %v4831_v62  ;;  %v2873_v54 = vor.u32 %v3681_v44, %v2870_v45  ;;  %v3030_v11 = vld [vmem:[%s5749_s1 + $0x1c8] sm:$0xf0]  ;;  %v3022_v15 = vld [vmem:[%s5749_s1 + $0x1b8] sm:$0xf0]  ;;  %v3735_v16 = vld [vmem:[%s5749_s1 + $0x234] sm:$0xf] }
  0x6b   : > { %1228 = vmatpush.bf16.msrb.mxu1 %v2833_v59  ;;  %1180 = vmatmul.bf16.gmra.mxu2 %v4833_v1  ;;  %v3741_v59 = vld [vmem:[%s5749_s1 + $0x264] sm:$0xf]  ;;  %v3025_v21 = vor.u32 %v3719_v14, %v3022_v15  ;;  %v3014_v25 = vld [vmem:[%s5749_s1 + $0x1a8] sm:$0xf0]  ;;  %v3715_v31 = vld [vmem:[%s5749_s1 + $0x194] sm:$0xf] }
  0x6c   : > { %1247 = vmatpush.bf16.msrb.mxu2 %v2897_v5  ;;  %1199 = vmatmul.bf16.gmra.mxu3 %v4841_v6  ;;  %v3113_v47 = vor.u32 %v3741_v59, %v3110_v60  ;;  %v3739_v5 = vld [vmem:[%s5749_s1 + $0x254] sm:$0xf]  ;;  %v3717_v24 = vld [vmem:[%s5749_s1 + $0x1a4] sm:$0xf]  ;;  %v3078_v22 = vld [vmem:[%s5749_s1 + $0x228] sm:$0xf0] }
  0x6d   : > { %1266 = vmatpush.bf16.msrb.mxu3 %v2961_v7  ;;  %v3102_v7 = vld [vmem:[%s5749_s1 + $0x258] sm:$0xf0]  ;;  %v3713_v38 = vld [vmem:[%s5749_s1 + $0x184] sm:$0xf]  ;;  %s576_s12 = scalar_lea.vmem [#allocation13], %s575_s24  ;;  %s2669_s8 = sshll.u32 %s2665_s20, 4  ;;  %s2670_s8 = int_to_ptr.hbm [resolvable:$true] %s2669_s8 }
  0x6e   : > { %1210 = vmatpush.bf16.msrb.mxu0 %v3077_v8  ;;  %v3041_v8 = vor.u32 %v3723_v2, %v3038_v3  ;;  %v3105_v9 = vor.u32 %v3739_v5, %v3102_v7  ;;  %v3006_v32 = vld [vmem:[%s5749_s1 + $0x198] sm:$0xf0]  ;;  %s2667_s27 = sshll.u32 %s576_s12, 4  ;;  %s2657_s28 = scalar_lea.sflag [#allocation4], %s575_s24  ;;  %s2668_s27 = int_to_ptr.vmem [resolvable:$true] %s2667_s27 }
  0x6f   : > { %1229 = vmatpush.bf16.msrb.mxu1 %v2825_v12  ;;  %v3033_v12 = vor.u32 %v3721_v10, %v3030_v11  ;;  %v3070_v35 = vld [vmem:[%s5749_s1 + $0x218] sm:$0xf0]  ;;  %v3009_v36 = vor.u32 %v3715_v31, %v3006_v32  ;;  %s4175_s7 = sshra.s32 %s2670_s8, 4  ;;  %s4181_s22 = scalar_lea.hbm %s5763_s15, 2  ;;  %s4176_s7 = int_to_ptr.hbm [resolvable:$true] %s4175_s7 }
  0x70   : > { %1248 = vmatpush.bf16.msrb.mxu2 %v2889_v23  ;;  %s4177_s18 = scalar_lea.hbm %s4176_s7, 1  ;;  %p4182_p3 = scmp.lt.s32.totalorder %s4176_s7, %s5763_s15 }
  0x71   : > { %1267 = vmatpush.bf16.msrb.mxu3 %v2953_v27  ;;  %v3733_v27 = vld [vmem:[%s5749_s1 + $0x224] sm:$0xf]  ;;  %p4178_p0 = scmp.ne.s32.totalorder %s4176_s7, %s4177_s18  ;;  %p4183_p4 = scmp.lt.s32.totalorder %s4181_s22, %s4177_s18 }
  0x72   : > { %1211 = vmatpush.bf16.msrb.mxu0 %v3069_v28  ;;  %v3017_v28 = vor.u32 %v3717_v24, %v3014_v25  ;;  %v3081_v29 = vor.u32 %v3733_v27, %v3078_v22  ;;  %v3178_v24 = vld [vmem:[%s5753_s5 + $0x60] sm:$0xf]  ;;  %v3758_v22 = vld [vmem:[%s5753_s5 + $0x64] sm:$0xf0] }
  0x73   : > { %1230 = vmatpush.bf16.msrb.mxu1 %v2817_v34  ;;  %v3731_v34 = vld [vmem:[%s5749_s1 + $0x214] sm:$0xf]  ;;  %p4179_p1 = pnand %p4178_p0, %p4367_p5  ;;  %p4184_p7 = por %p4183_p4, %p4182_p3 }
  0x74   : > { %1249 = vmatpush.bf16.msrb.mxu2 %v2881_v41  ;;  %v3073_v37 = vor.u32 %v3731_v34, %v3070_v35  ;;  %v3179_v34 = vor.u32 %v3758_v22, %v3178_v24  ;;  %v3766_v22 = vld [vmem:[%s5753_s5 + $0xa4] sm:$0xf0] }
  0x75   : > { %1268 = vmatpush.bf16.msrb.mxu3 %v2945_v43  ;;  %p4180_p2 = pneg %p4179_p1 }
  0x76   : > { %1212 = vmatpush.bf16.msrb.mxu0 %v3061_v18 }
  0x77   : > { %1231 = vmatpush.bf16.msrb.mxu1 %v2809_v46  ;;  %p4185_p8 = pnand %p4184_p7, %p4180_p2 }
  0x78   : > { %1250 = vmatpush.bf16.msrb.mxu2 %v2873_v54 }
  0x79   : > { %1269 = vmatpush.bf16.msrb.mxu3 %v2937_v55  ;;  %1213 = vmatmul.bf16.vlgmr.msrb.gmra.mxu0 %v4932_v33 }
  0x7a   : > { %1281 = vmatpush.bf16.msra.mxu0 %v3057_v50  ;;  %1232 = vmatmul.bf16.vlgmr.msrb.gmra.mxu1 %v4695_v58  ;;  %v3737_v58 = vld [vmem:[%s5749_s1 + $0x244] sm:$0xf] }
  0x7b   : > { %1300 = vmatpush.bf16.msra.mxu1 %v3121_v53  ;;  %1251 = vmatmul.bf16.vlgmr.msrb.gmra.mxu2 %v4706_v63  ;;  %v3094_v63 = vld [vmem:[%s5749_s1 + $0x248] sm:$0xf0] }
  0x7c   : > { %1270 = vmatmul.bf16.vlgmr.msrb.gmra.mxu3 %v4708_v0  ;;  %v633_v0 = vrot.slane %v4747_v19, 4  ;;  %v3097_v13 = vor.u32 %v3737_v58, %v3094_v63  ;;  %v3086_v19 = vld [vmem:[%s5749_s1 + $0x238] sm:$0xf0] }
  0x7d   : > { %v3089_v23 = vor.u32 %v3735_v16, %v3086_v19  ;;  %v3186_v16 = vld [vmem:[%s5753_s5 + $0x70] sm:$0xf]  ;;  %v3760_v19 = vld [vmem:[%s5753_s5 + $0x74] sm:$0xf0] }
  0x7e   : > { %1282 = vmatpush.bf16.msra.mxu0 %v3049_v61  ;;  %v634_v20 = vsel %vm627_vm3, %v631_v39, %v633_v0  ;;  %v2998_v39 = vld [vmem:[%s5749_s1 + $0x188] sm:$0xf0] }
  0x7f   : > { %1301 = vmatpush.bf16.msra.mxu1 %v3113_v47  ;;  %v648_v26 = vpack.c.bf16 %v633_v0, %v634_v20  ;;  %v3187_v20 = vor.u32 %v3760_v19, %v3186_v16 }
  0x82   : > { %1283 = vmatpush.bf16.msra.mxu0 %v3041_v8 }
  0x83   : > { %1302 = vmatpush.bf16.msra.mxu1 %v3105_v9 }
  0x86   : > { %1284 = vmatpush.bf16.msra.mxu0 %v3033_v12 }
  0x87   : > { %1303 = vmatpush.bf16.msra.mxu1 %v3097_v13 }
  0x89   : > { %1218 = vmatmul.bf16.gmra.mxu0 %v648_v26 }
  0x8a   : > { %1285 = vmatpush.bf16.msra.mxu0 %v3025_v21  ;;  %1237 = vmatmul.bf16.gmra.mxu1 %v4820_v57  ;;  %v3729_v57 = vld [vmem:[%s5749_s1 + $0x204] sm:$0xf]  ;;  %v3250_v21 = vld [vmem:[%s5753_s5 + $0xf0] sm:$0xf] }
  0x8b   : > { %1304 = vmatpush.bf16.msra.mxu1 %v3089_v23  ;;  %1256 = vmatmul.bf16.gmra.mxu2 %v4831_v62  ;;  %v3062_v62 = vld [vmem:[%s5749_s1 + $0x208] sm:$0xf0]  ;;  %v3776_v23 = vld [vmem:[%s5753_s5 + $0xf4] sm:$0xf0] }
  0x8c   : > { %1275 = vmatmul.bf16.gmra.mxu3 %v4833_v1  ;;  %v3001_v1 = vor.u32 %v3713_v38, %v2998_v39  ;;  %v3065_v40 = vor.u32 %v3729_v57, %v3062_v62  ;;  %v3251_v27 = vor.u32 %v3776_v23, %v3250_v21  ;;  %v3756_v38 = vld [vmem:[%s5753_s5 + $0x54] sm:$0xf0]  ;;  %v3234_v62 = vld [vmem:[%s5753_s5 + $0xd0] sm:$0xf] }
  0x8e   : > { %1286 = vmatpush.bf16.msra.mxu0 %v3017_v28  ;;  %v3242_v28 = vld [vmem:[%s5753_s5 + $0xe0] sm:$0xf] }
  0x8f   : > { %1305 = vmatpush.bf16.msra.mxu1 %v3081_v29  ;;  %v3774_v29 = vld [vmem:[%s5753_s5 + $0xe4] sm:$0xf0] }
  0x92   : > { %1287 = vmatpush.bf16.msra.mxu0 %v3009_v36  ;;  %v3243_v36 = vor.u32 %v3774_v29, %v3242_v28  ;;  %v1323_v28 = vld [vmem:[%s5750_s2] sm:$0xff] }
  0x93   : > { %1306 = vmatpush.bf16.msra.mxu1 %v3073_v37  ;;  %v3170_v37 = vld [vmem:[%s5753_s5 + $0x50] sm:$0xf] }
  0x96   : > { %1288 = vmatpush.bf16.msra.mxu0 %v3001_v1  ;;  %v3772_v1 = vld [vmem:[%s5753_s5 + $0xd4] sm:$0xf0] }
  0x97   : > { %1307 = vmatpush.bf16.msra.mxu1 %v3065_v40 }
  0x99   : > { %1289 = vmatmul.bf16.vlgmr.msra.gmra.mxu0 %v4716_v4 }
  0x9a   : > { %1308 = vmatmul.bf16.vlgmr.msra.gmra.mxu1 %v4932_v33  ;;  %1904 = vmatpush.bf16.msrb.mxu0 %v3187_v20 }
  0x9b   : > { %1918 = vmatpush.bf16.msrb.mxu1 %v3251_v27  ;;  %v3210_v27 = vld [vmem:[%s5753_s5 + $0xa0] sm:$0xf] }
  0x9e   : > { %1905 = vmatpush.bf16.msrb.mxu0 %v3179_v34 }
  0x9f   : > { %1919 = vmatpush.bf16.msrb.mxu1 %v3243_v36  ;;  %v3790_v36 = vld [vmem:[%s5753_s5 + $0x164] sm:$0xf0] }
  0xa9   : > { %1294 = vmatmul.bf16.gmra.mxu0 %v4841_v6 }
  0xaa   : > { %1313 = vmatmul.bf16.gmra.mxu1 %v648_v26 }
  0xd6   : > { %v1138_v41 = vpop.f32.mrf.mxu0 }
  0xd7   : > { %v1157_v42 = vpop.f32.mrf.mxu1 }
  0xd8   : > { %v1158_v17 = vadd.f32 %v1157_v42, %v1138_v41 }
  0xde   : > { %v1176_v43 = vpop.f32.mrf.mxu2  ;;  %v1140_v44 = vpop.f32.mrf.mxu0 }
  0xdf   : > { %v1177_v18 = vadd.f32 %v1176_v43, %v1158_v17  ;;  %v1195_v45 = vpop.f32.mrf.mxu3  ;;  %v1159_v46 = vpop.f32.mrf.mxu1  ;;  %v3171_v43 = vor.u32 %v3756_v38, %v3170_v37  ;;  %v3806_v38 = vld [vmem:[%s5753_s5 + $0x1e4] sm:$0xf0] }
  0xe0   : > { %v5026_v48 = vadd.f32 %v1159_v46, %v1140_v44  ;;  %v3235_v44 = vor.u32 %v3772_v1, %v3234_v62  ;;  %v3754_v46 = vld [vmem:[%s5753_s5 + $0x44] sm:$0xf0]  ;;  %v3748_v62 = vld [vmem:[%s5753_s5 + $0x14] sm:$0xf0]  ;;  %v3202_v1 = vld [vmem:[%s5753_s5 + $0x90] sm:$0xf] }
  0xe1   : > { %v1196_v49 = vadd.f32 %v1195_v45, %v1177_v18  ;;  %v3162_v45 = vld [vmem:[%s5753_s5 + $0x40] sm:$0xf]  ;;  %1906 = vmatpush.bf16.msrb.mxu0 %v3171_v43  ;;  %v3788_v43 = vld [vmem:[%s5753_s5 + $0x154] sm:$0xf0] }
  0xe2   : > { %1920 = vmatpush.bf16.msrb.mxu1 %v3235_v44 }
  0xe6   : > { %v1143_v50 = vpop.f32.mrf.mxu0  ;;  %v5028_v4 = vpop.f32.mrf.mxu2 }
  0xe7   : > { %v1162_v51 = vpop.f32.mrf.mxu1  ;;  %v5030_v53 = vpop.f32.mrf.mxu3 }
  0xe8   : > { %v1163_v52 = vadd.f32 %v1162_v51, %v1143_v50 }
  0xee   : > { %v1145_v6 = vpop.f32.mrf.mxu0  ;;  %v1181_v55 = vpop.f32.mrf.mxu2 }
  0xef   : > { %v1164_v54 = vpop.f32.mrf.mxu1  ;;  %v5034_v59 = vpop.f32.mrf.mxu3  ;;  %v1182_v18 = vadd.f32 %v1181_v55, %v1163_v52  ;;  %v3770_v52 = vld [vmem:[%s5753_s5 + $0xc4] sm:$0xf0] }
  0xf0   : > { %v1165_v35 = vadd.f32 %v1164_v54, %v1145_v6  ;;  %v3226_v6 = vld [vmem:[%s5753_s5 + $0xc0] sm:$0xf]  ;;  %v1179_v54 = vadd.f32 %v5028_v4, %v5026_v48 }
  0xf6   : > { %v1214_v56 = vpop.f32.mrf.mxu0  ;;  %v1183_v60 = vpop.f32.mrf.mxu2 }
  0xf7   : > { %v5032_v30 = vadd.f32 %v1214_v56, %v1196_v49  ;;  %v1233_v33 = vpop.f32.mrf.mxu1  ;;  %v1202_v2 = vpop.f32.mrf.mxu3  ;;  %v1184_v40 = vadd.f32 %v1183_v60, %v1165_v35  ;;  %v3306_v35 = vld [vmem:[%s5753_s5 + $0x160] sm:$0xf] }
  0xf9   : > { %v1203_v55 = vadd.f32 %v1202_v2, %v1184_v40  ;;  %v3752_v2 = vld [vmem:[%s5753_s5 + $0x34] sm:$0xf0] }
  0xfa   : > { %v3764_v40 = vld [vmem:[%s5753_s5 + $0x94] sm:$0xf0] }
  0xfe   : > { %v5036_v61 = vpop.f32.mrf.mxu0  ;;  %v1252_v7 = vpop.f32.mrf.mxu2 }
  0xff   : > { %v1235_v47 = vpop.f32.mrf.mxu1  ;;  %v1271_v8 = vpop.f32.mrf.mxu3  ;;  %v1253_v42 = vadd.f32 %v1252_v7, %v1233_v33  ;;  %v1201_v7 = vadd.f32 %v5034_v59, %v1182_v18  ;;  %v3218_v59 = vld [vmem:[%s5753_s5 + $0xb0] sm:$0xf] }
 0x100   : > { %v3362_v18 = vld [vmem:[%s5753_s5 + $0x1d0] sm:$0xf] }
 0x101   : > { %v1272_v33 = vadd.f32 %v1271_v8, %v1253_v42  ;;  %v3768_v8 = vld [vmem:[%s5753_s5 + $0xb4] sm:$0xf0] }
 0x102   : > { %v3219_v20 = vor.u32 %v3768_v8, %v3218_v59  ;;  %v3822_v59 = vld [vmem:[%s5753_s5 + $0x264] sm:$0xf0]  ;;  %v3757_v8 = vld [vmem:[%s5753_s5 + $0x64] sm:$0xf] }
 0x106   : > { %v5038_v3 = vpop.f32.mrf.mxu0  ;;  %v1254_v11 = vpop.f32.mrf.mxu2 }
 0x107   : > { %v1238_v5 = vpop.f32.mrf.mxu1  ;;  %v1273_v58 = vpop.f32.mrf.mxu3  ;;  %v1255_v39 = vadd.f32 %v1254_v11, %v1235_v47  ;;  %v3227_v11 = vor.u32 %v3770_v52, %v3226_v6  ;;  %v1220_v16 = vadd.f32 %v5038_v3, %v1201_v7  ;;  %v3792_v3 = vld [vmem:[%s5753_s5 + $0x174] sm:$0xf0]  ;;  %v3194_v6 = vld [vmem:[%s5753_s5 + $0x80] sm:$0xf]  ;;  %v3762_v52 = vld [vmem:[%s5753_s5 + $0x84] sm:$0xf0] }
 0x108   : > { %v3290_v7 = vld [vmem:[%s5753_s5 + $0x140] sm:$0xf] }
 0x109   : > { %v1274_v49 = vadd.f32 %v1273_v58, %v1255_v39  ;;  %v3154_v58 = vld [vmem:[%s5753_s5 + $0x30] sm:$0xf]  ;;  %1921 = vmatpush.bf16.msrb.mxu1 %v3227_v11  ;;  %v3211_v39 = vor.u32 %v3766_v22, %v3210_v27  ;;  %v3786_v11 = vld [vmem:[%s5753_s5 + $0x144] sm:$0xf0]  ;;  %v3338_v22 = vld [vmem:[%s5753_s5 + $0x1a0] sm:$0xf] }
 0x10a   : > { %v3155_v19 = vor.u32 %v3752_v2, %v3154_v58  ;;  %v3354_v58 = vld [vmem:[%s5753_s5 + $0x1c0] sm:$0xf]  ;;  %v3782_v27 = vld [vmem:[%s5753_s5 + $0x124] sm:$0xf0] }
 0x10b   : > { %v3434_v2 = vld [vmem:[%s5753_s5 + $0x260] sm:$0xf] }
 0x10d   : > { %1922 = vmatpush.bf16.msrb.mxu1 %v3219_v20  ;;  %v3346_v20 = vld [vmem:[%s5753_s5 + $0x1b0] sm:$0xf] }
 0x10e   : > { %v5040_v9 = vpop.f32.mrf.mxu0  ;;  %v1257_v12 = vpop.f32.mrf.mxu2 }
 0x10f   : > { %v1240_v10 = vpop.f32.mrf.mxu1  ;;  %v1276_v15 = vpop.f32.mrf.mxu3  ;;  %v1258_v31 = vadd.f32 %v1257_v12, %v1238_v5  ;;  %v3163_v5 = vor.u32 %v3754_v46, %v3162_v45  ;;  %v1222_v12 = vadd.f32 %v5040_v9, %v1203_v55  ;;  %v3804_v45 = vld [vmem:[%s5753_s5 + $0x1d4] sm:$0xf0]  ;;  %v3203_v46 = vor.u32 %v3764_v40, %v3202_v1  ;;  %v3759_v55 = vld [vmem:[%s5753_s5 + $0x74] sm:$0xf]  ;;  %v3258_v40 = vld [vmem:[%s5753_s5 + $0x100] sm:$0xf] }
 0x111   : > { %v1277_v17 = vadd.f32 %v1276_v15, %v1258_v31  ;;  %1907 = vmatpush.bf16.msrb.mxu0 %v3163_v5  ;;  %v1358_v31 = vld [vmem:[%s5751_s3] sm:$0xff]  ;;  %1923 = vmatpush.bf16.msrb.mxu1 %v3211_v39  ;;  %v3363_v5 = vor.u32 %v3804_v45, %v3362_v18  ;;  %v3796_v39 = vld [vmem:[%s5753_s5 + $0x194] sm:$0xf0]  ;;  %v3164_v45 = vld [vmem:[%s5753_s5 + $0x48] sm:$0xf0] }
 0x112   : > { %v3753_v18 = vld [vmem:[%s5753_s5 + $0x44] sm:$0xf] }
 0x115   : > { %1908 = vmatpush.bf16.msrb.mxu0 %v3155_v19  ;;  %1924 = vmatpush.bf16.msrb.mxu1 %v3203_v46  ;;  %v3784_v19 = vld [vmem:[%s5753_s5 + $0x134] sm:$0xf0]  ;;  %v3410_v46 = vld [vmem:[%s5753_s5 + $0x230] sm:$0xf] }
 0x116   : > { %v1290_v63 = vpop.f32.mrf.mxu0  ;;  %v1259_v25 = vpop.f32.mrf.mxu2 }
 0x117   : > { %v5042_v0 = vpop.f32.mrf.mxu1  ;;  %v1260_v57 = vadd.f32 %v1259_v25, %v1240_v10  ;;  %v1278_v41 = vpop.f32.mrf.mxu3  ;;  %v1291_v15 = vadd.f32 %v1290_v63, %v1272_v33  ;;  %v1324_v33 = vld [vmem:[%s5750_s2 + $0x8] sm:$0x3f] }
 0x119   : > { %v1279_v50 = vadd.f32 %v1278_v41, %v1260_v57  ;;  %v1310_v23 = vadd.f32 %v5042_v0, %v1291_v15  ;;  %v3146_v0 = vld [vmem:[%s5753_s5 + $0x20] sm:$0xf]  ;;  %v3138_v57 = vld [vmem:[%s5753_s5 + $0x10] sm:$0xf]  ;;  %v3307_v41 = vor.u32 %v3790_v36, %v3306_v35  ;;  %v3195_v15 = vor.u32 %v3762_v52, %v3194_v6  ;;  %v3775_v6 = vld [vmem:[%s5753_s5 + $0xf4] sm:$0xf] }
 0x11a   : > { %v3139_v44 = vor.u32 %v3748_v62, %v3138_v57  ;;  %v3252_v52 = vld [vmem:[%s5753_s5 + $0xf8] sm:$0xf0] }
 0x11b   : > { %v1319_v29 = vmax.f32 %v5032_v30, %v1310_v23  ;;  %v3370_v30 = vld [vmem:[%s5753_s5 + $0x1e0] sm:$0xf]  ;;  %1925 = vmatpush.bf16.msrb.mxu1 %v3195_v15  ;;  %v3435_v23 = vor.u32 %v3822_v59, %v3434_v2  ;;  %v3789_v15 = vld [vmem:[%s5753_s5 + $0x164] sm:$0xf] }
 0x11c   : > { %v3371_v42 = vor.u32 %v3806_v38, %v3370_v30  ;;  %v3780_v30 = vld [vmem:[%s5753_s5 + $0x114] sm:$0xf0]  ;;  %v3330_v38 = vld [vmem:[%s5753_s5 + $0x190] sm:$0xf]  ;;  %v3749_v59 = vld [vmem:[%s5753_s5 + $0x24] sm:$0xf] }
 0x11d   : > { %v3331_v1 = vor.u32 %v3796_v39, %v3330_v38  ;;  %v3783_v38 = vld [vmem:[%s5753_s5 + $0x134] sm:$0xf] }
 0x11e   : > { %v1292_v13 = vpop.f32.mrf.mxu0 }
 0x11f   : > { %v5044_v14 = vpop.f32.mrf.mxu1  ;;  %v1293_v60 = vadd.f32 %v1292_v13, %v1274_v49  ;;  %v1198_v13 = vadd.f32 %v5030_v53, %v1179_v54  ;;  %v3314_v53 = vld [vmem:[%s5753_s5 + $0x170] sm:$0xf]  ;;  %v3130_v49 = vld [vmem:[%s5753_s5] sm:$0xf]  ;;  %v3824_v54 = vld [vmem:[%s5753_s5 + $0x274] sm:$0xf0] }
 0x121   : > { %v1312_v9 = vadd.f32 %v5044_v14, %v1293_v60  ;;  %v1217_v21 = vadd.f32 %v5036_v61, %v1198_v13  ;;  %v3378_v14 = vld [vmem:[%s5753_s5 + $0x1f0] sm:$0xf]  ;;  %v3808_v61 = vld [vmem:[%s5753_s5 + $0x1f4] sm:$0xf0]  ;;  %v1359_v60 = vld [vmem:[%s5751_s3 + $0x8] sm:$0x3f] }
 0x122   : > { %v3379_v34 = vor.u32 %v3808_v61, %v3378_v14  ;;  %v3180_v13 = vld [vmem:[%s5753_s5 + $0x68] sm:$0xf0]  ;;  %v3755_v14 = vld [vmem:[%s5753_s5 + $0x54] sm:$0xf]  ;;  %v3172_v61 = vld [vmem:[%s5753_s5 + $0x58] sm:$0xf0] }
 0x123   : > { %v1320_v25 = vmax.f32 %v1217_v21, %v1312_v9  ;;  %v3800_v21 = vld [vmem:[%s5753_s5 + $0x1b4] sm:$0xf0] }
 0x126   : > { %v1295_v26 = vpop.f32.mrf.mxu0 }
 0x127   : > { %v1314_v32 = vpop.f32.mrf.mxu1  ;;  %v1296_v51 = vadd.f32 %v1295_v26, %v1277_v17  ;;  %v3750_v26 = vld [vmem:[%s5753_s5 + $0x24] sm:$0xf0]  ;;  %v3298_v17 = vld [vmem:[%s5753_s5 + $0x150] sm:$0xf] }
 0x128   : > { %v3147_v37 = vor.u32 %v3750_v26, %v3146_v0  ;;  %v3274_v26 = vld [vmem:[%s5753_s5 + $0x120] sm:$0xf] }
 0x129   : > { %v1315_v48 = vadd.f32 %v1314_v32, %v1296_v51  ;;  %v3315_v32 = vor.u32 %v3792_v3, %v3314_v53  ;;  %v3442_v51 = vld [vmem:[%s5753_s5 + $0x270] sm:$0xf]  ;;  %v3820_v3 = vld [vmem:[%s5753_s5 + $0x254] sm:$0xf0]  ;;  %v3275_v35 = vor.u32 %v3782_v27, %v3274_v26  ;;  %v3769_v26 = vld [vmem:[%s5753_s5 + $0xc4] sm:$0xf] }
 0x12a   : > { %1909 = vmatpush.bf16.msrb.mxu0 %v3147_v37  ;;  %v3426_v53 = vld [vmem:[%s5753_s5 + $0x250] sm:$0xf] }
 0x12b   : > { %v1321_v24 = vmax.f32 %v1220_v16, %v1315_v48  ;;  %v3443_v48 = vor.u32 %v3824_v54, %v3442_v51  ;;  %v3291_v16 = vor.u32 %v3786_v11, %v3290_v7  ;;  %v3266_v37 = vld [vmem:[%s5753_s5 + $0x110] sm:$0xf]  ;;  %v3791_v54 = vld [vmem:[%s5753_s5 + $0x174] sm:$0xf]  ;;  %v3402_v7 = vld [vmem:[%s5753_s5 + $0x220] sm:$0xf] }
 0x12c   : > { %v3267_v62 = vor.u32 %v3780_v30, %v3266_v37  ;;  %v3773_v11 = vld [vmem:[%s5753_s5 + $0xe4] sm:$0xf]  ;;  %v3767_v37 = vld [vmem:[%s5753_s5 + $0xb4] sm:$0xf]  ;;  %v3220_v30 = vld [vmem:[%s5753_s5 + $0xb8] sm:$0xf0] }
 0x12d   : > { %v3223_v39 = vor.u32 %v3767_v37, %v3220_v30  ;;  %v3356_v37 = vld [vmem:[%s5753_s5 + $0x1c8] sm:$0xf0] }
 0x12e   : > { %v1297_v56 = vpop.f32.mrf.mxu0  ;;  %1910 = vmatpush.bf16.msrb.mxu0 %v3139_v44 }
 0x12f   : > { %v1298_v47 = vadd.f32 %v1297_v56, %v1279_v50  ;;  %v1316_v10 = vpop.f32.mrf.mxu1  ;;  %v3746_v50 = vld [vmem:[%s5753_s5 + $0x4] sm:$0xf0]  ;;  %v3188_v56 = vld [vmem:[%s5753_s5 + $0x78] sm:$0xf0] }
 0x131   : > { %v1317_v4 = vadd.f32 %v1316_v10, %v1298_v47  ;;  %v3299_v47 = vor.u32 %v3788_v43, %v3298_v17  ;;  %v3131_v10 = vor.u32 %v3746_v50, %v3130_v49  ;;  %v3794_v43 = vld [vmem:[%s5753_s5 + $0x184] sm:$0xf0]  ;;  %v3816_v49 = vld [vmem:[%s5753_s5 + $0x234] sm:$0xf0]  ;;  %v3167_v50 = vor.u32 %v3753_v18, %v3164_v45  ;;  %v3763_v18 = vld [vmem:[%s5753_s5 + $0x94] sm:$0xf] }
 0x132   : > { %v3411_v51 = vor.u32 %v3816_v49, %v3410_v46  ;;  %v3779_v45 = vld [vmem:[%s5753_s5 + $0x114] sm:$0xf]  ;;  %v3268_v46 = vld [vmem:[%s5753_s5 + $0x118] sm:$0xf0] }
 0x133   : > { %v1322_v63 = vmax.f32 %v1222_v12, %v1317_v4  ;;  %v3802_v12 = vld [vmem:[%s5753_s5 + $0x1c4] sm:$0xf0]  ;;  %v3191_v4 = vor.u32 %v3759_v55, %v3188_v56  ;;  %1911 = vmatpush.bf16.msrb.mxu0 %v3131_v10  ;;  %v3255_v55 = vor.u32 %v3775_v6, %v3252_v52  ;;  %v3316_v56 = vld [vmem:[%s5753_s5 + $0x178] sm:$0xf0]  ;;  %v3196_v6 = vld [vmem:[%s5753_s5 + $0x88] sm:$0xf0] }
 0x134   : > { %v3355_v9 = vor.u32 %v3802_v12, %v3354_v58  ;;  %v3814_v10 = vld [vmem:[%s5753_s5 + $0x224] sm:$0xf0]  ;;  %v3244_v12 = vld [vmem:[%s5753_s5 + $0xe8] sm:$0xf0]  ;;  %v3777_v52 = vld [vmem:[%s5753_s5 + $0x104] sm:$0xf] }
 0x135   : > { %3122 = vmatpush.msk.msra.mxu2 %vm627_vm3, %v1322_v63  ;;  %3125 = vmatpush.msk.msra.mxu3 %vm627_vm3, %v1322_v63  ;;  %v3282_v63 = vld [vmem:[%s5753_s5 + $0x130] sm:$0xf]  ;;  %v3403_v58 = vor.u32 %v3814_v10, %v3402_v7 }
 0x136   : > { %1974 = vmatpush.bf16.msra.mxu1 %v3191_v4  ;;  %v3283_v0 = vor.u32 %v3784_v19, %v3282_v63  ;;  %v3247_v4 = vor.u32 %v3773_v11, %v3244_v12  ;;  %v3771_v63 = vld [vmem:[%s5753_s5 + $0xd4] sm:$0xf] }
 0x137   : > { %1348 = vmatpush.msra.mxu2 %v1321_v24  ;;  %1379 = vmatpush.msra.mxu3 %v1321_v24  ;;  %v3183_v24 = vor.u32 %v3757_v8, %v3180_v13  ;;  %v3148_v8 = vld [vmem:[%s5753_s5 + $0x28] sm:$0xf0]  ;;  %v3807_v12 = vld [vmem:[%s5753_s5 + $0x1f4] sm:$0xf] }
 0x138   : > { %1960 = vmatpush.bf16.msra.mxu0 %v3443_v48  ;;  %v3308_v48 = vld [vmem:[%s5753_s5 + $0x168] sm:$0xf0]  ;;  %v3151_v13 = vor.u32 %v3749_v59, %v3148_v8 }
 0x139   : > { %1349 = vmatpush.msra.mxu2 %v1320_v25  ;;  %1380 = vmatpush.msra.mxu3 %v1320_v25  ;;  %v3347_v25 = vor.u32 %v3800_v21, %v3346_v20  ;;  %v3311_v2 = vor.u32 %v3789_v15, %v3308_v48  ;;  %v3236_v20 = vld [vmem:[%s5753_s5 + $0xd8] sm:$0xf0]  ;;  %v3787_v21 = vld [vmem:[%s5753_s5 + $0x154] sm:$0xf] }
 0x13a   : > { %1975 = vmatpush.bf16.msra.mxu1 %v3183_v24  ;;  %v3239_v24 = vor.u32 %v3771_v63, %v3236_v20  ;;  %v3380_v15 = vld [vmem:[%s5753_s5 + $0x1f8] sm:$0xf0] }
 0x13b   : > { %1350 = vmatpush.msra.mxu2 %v1319_v29  ;;  %1381 = vmatpush.msra.mxu3 %v1319_v29  ;;  %v3427_v29 = vor.u32 %v3820_v3, %v3426_v53  ;;  %v3747_v3 = vld [vmem:[%s5753_s5 + $0x14] sm:$0xf]  ;;  %v3383_v59 = vor.u32 %v3807_v12, %v3380_v15  ;;  %v3388_v12 = vld [vmem:[%s5753_s5 + $0x208] sm:$0xf0] }
 0x13c   : > { %3123 = vmatmul.msk.f32.vlgmr.msra.gmra.mxu2 %vm1325_vm4, %v1323_v28  ;;  %3126 = vmatmul.msk.f32.vlgmr.msra.gmra.mxu3 %vm1325_vm4, %v1358_v31  ;;  %v3798_v28 = vld [vmem:[%s5753_s5 + $0x1a4] sm:$0xf0]  ;;  %v3175_v31 = vor.u32 %v3755_v14, %v3172_v61  ;;  %v3140_v14 = vld [vmem:[%s5753_s5 + $0x18] sm:$0xf0] }
 0x13d   : > { %1932 = vmatpush.bf16.msrb.mxu2 %v3315_v32  ;;  %1946 = vmatpush.bf16.msrb.mxu3 %v3379_v34  ;;  %v3418_v32 = vld [vmem:[%s5753_s5 + $0x240] sm:$0xf]  ;;  %v3818_v34 = vld [vmem:[%s5753_s5 + $0x244] sm:$0xf0]  ;;  %v3339_v36 = vor.u32 %v3798_v28, %v3338_v22  ;;  %v3143_v61 = vor.u32 %v3747_v3, %v3140_v14  ;;  %v3228_v22 = vld [vmem:[%s5753_s5 + $0xc8] sm:$0xf0] }
 0x13e   : > { %1961 = vmatpush.bf16.msra.mxu0 %v3435_v23  ;;  %1976 = vmatpush.bf16.msra.mxu1 %v3175_v31  ;;  %v3419_v57 = vor.u32 %v3818_v34, %v3418_v32  ;;  %v3300_v23 = vld [vmem:[%s5753_s5 + $0x158] sm:$0xf0]  ;;  %v3785_v28 = vld [vmem:[%s5753_s5 + $0x144] sm:$0xf]  ;;  %v3231_v31 = vor.u32 %v3769_v26, %v3228_v22  ;;  %v3436_v22 = vld [vmem:[%s5753_s5 + $0x268] sm:$0xf0] }
 0x13f   : > { %v3303_v53 = vor.u32 %v3787_v21, %v3300_v23  ;;  %v3745_v34 = vld [vmem:[%s5753_s5 + $0x4] sm:$0xf]  ;;  %v3372_v23 = vld [vmem:[%s5753_s5 + $0x1e8] sm:$0xf0] }
 0x141   : > { %1933 = vmatpush.bf16.msrb.mxu2 %v3307_v41  ;;  %1947 = vmatpush.bf16.msrb.mxu3 %v3371_v42  ;;  %v3778_v41 = vld [vmem:[%s5753_s5 + $0x104] sm:$0xf0]  ;;  %v3322_v42 = vld [vmem:[%s5753_s5 + $0x180] sm:$0xf] }
 0x142   : > { %1962 = vmatpush.bf16.msra.mxu0 %v3427_v29  ;;  %v3259_v17 = vor.u32 %v3778_v41, %v3258_v40  ;;  %v3323_v44 = vor.u32 %v3794_v43, %v3322_v42  ;;  %1977 = vmatpush.bf16.msra.mxu1 %v3167_v50  ;;  %v3292_v29 = vld [vmem:[%s5753_s5 + $0x148] sm:$0xf0]  ;;  %v3781_v41 = vld [vmem:[%s5753_s5 + $0x124] sm:$0xf]  ;;  %v3271_v50 = vor.u32 %v3779_v45, %v3268_v46 }
 0x143   : > { %v3295_v32 = vor.u32 %v3785_v28, %v3292_v29  ;;  %v3212_v40 = vld [vmem:[%s5753_s5 + $0xa8] sm:$0xf0]  ;;  %v3803_v28 = vld [vmem:[%s5753_s5 + $0x1d4] sm:$0xf]  ;;  %v3364_v29 = vld [vmem:[%s5753_s5 + $0x1d8] sm:$0xf0] }
 0x144   : > { %3124 = vmatmul.msk.f32.gmra.mxu2 %vm1325_vm4, %v1324_v33  ;;  %3127 = vmatmul.msk.f32.gmra.mxu3 %vm1325_vm4, %v1359_v60  ;;  %v3751_v33 = vld [vmem:[%s5753_s5 + $0x34] sm:$0xf]  ;;  %v3156_v60 = vld [vmem:[%s5753_s5 + $0x38] sm:$0xf0]  ;;  %v3276_v42 = vld [vmem:[%s5753_s5 + $0x128] sm:$0xf0] }
 0x145   : > { %1934 = vmatpush.bf16.msrb.mxu2 %v3299_v47  ;;  %1948 = vmatpush.bf16.msrb.mxu3 %v3363_v5  ;;  %v3319_v47 = vor.u32 %v3791_v54, %v3316_v56  ;;  %v3159_v5 = vor.u32 %v3751_v33, %v3156_v60  ;;  %v3279_v43 = vor.u32 %v3781_v41, %v3276_v42  ;;  %v3348_v41 = vld [vmem:[%s5753_s5 + $0x1b8] sm:$0xf0]  ;;  %v3797_v46 = vld [vmem:[%s5753_s5 + $0x1a4] sm:$0xf] }
 0x146   : > { %1963 = vmatpush.bf16.msra.mxu0 %v3419_v57  ;;  %v3284_v57 = vld [vmem:[%s5753_s5 + $0x138] sm:$0xf0] }
 0x147   : > { %1978 = vmatpush.bf16.msra.mxu1 %v3159_v5  ;;  %v3979_v5 = vld [vmem:[%s5752_s4] ss:$0 sm:$0xff] }
 0x149   : > { %1935 = vmatpush.bf16.msrb.mxu2 %v3291_v16  ;;  %1949 = vmatpush.bf16.msrb.mxu3 %v3355_v9  ;;  %v3394_v16 = vld [vmem:[%s5753_s5 + $0x210] sm:$0xf]  ;;  %v3812_v9 = vld [vmem:[%s5753_s5 + $0x214] sm:$0xf0] }
 0x14a   : > { %1964 = vmatpush.bf16.msra.mxu0 %v3411_v51  ;;  %v3395_v19 = vor.u32 %v3812_v9, %v3394_v16  ;;  %v3761_v51 = vld [vmem:[%s5753_s5 + $0x84] sm:$0xf] }
 0x14b   : > { %1979 = vmatpush.bf16.msra.mxu1 %v3151_v13  ;;  %v3199_v54 = vor.u32 %v3761_v51, %v3196_v6  ;;  %v3805_v9 = vld [vmem:[%s5753_s5 + $0x1e4] sm:$0xf] }
 0x14c   : > { %v3375_v26 = vor.u32 %v3805_v9, %v3372_v23  ;;  %v3813_v6 = vld [vmem:[%s5753_s5 + $0x224] sm:$0xf] }
 0x14d   : > { %1936 = vmatpush.bf16.msrb.mxu2 %v3283_v0  ;;  %1950 = vmatpush.bf16.msrb.mxu3 %v3347_v25  ;;  %v3386_v0 = vld [vmem:[%s5753_s5 + $0x200] sm:$0xf]  ;;  %v3810_v25 = vld [vmem:[%s5753_s5 + $0x204] sm:$0xf0] }
 0x14e   : > { %1965 = vmatpush.bf16.msra.mxu0 %v3403_v58  ;;  %v3387_v27 = vor.u32 %v3810_v25, %v3386_v0 }
 0x14f   : > { %1980 = vmatpush.bf16.msra.mxu1 %v3143_v61 }
 0x151   : > { %1937 = vmatpush.bf16.msrb.mxu2 %v3275_v35  ;;  %1951 = vmatpush.bf16.msrb.mxu3 %v3339_v36  ;;  %v3132_v35 = vld [vmem:[%s5753_s5 + $0x8] sm:$0xf0] }
 0x152   : > { %1966 = vmatpush.bf16.msra.mxu0 %v3395_v19  ;;  %v3135_v36 = vor.u32 %v3745_v34, %v3132_v35  ;;  %v3819_v34 = vld [vmem:[%s5753_s5 + $0x254] sm:$0xf]  ;;  %v3428_v35 = vld [vmem:[%s5753_s5 + $0x258] sm:$0xf0] }
 0x154   : > { %1981 = vmatpush.bf16.msra.mxu1 %v3135_v36  ;;  %v3801_v36 = vld [vmem:[%s5753_s5 + $0x1c4] sm:$0xf] }
 0x155   : > { %1938 = vmatpush.bf16.msrb.mxu2 %v3267_v62  ;;  %1952 = vmatpush.bf16.msrb.mxu3 %v3331_v1  ;;  %v3287_v62 = vor.u32 %v3783_v38, %v3284_v57  ;;  %v3765_v1 = vld [vmem:[%s5753_s5 + $0xa4] sm:$0xf]  ;;  %v3431_v38 = vor.u32 %v3819_v34, %v3428_v35 }
 0x156   : > { %1967 = vmatpush.bf16.msra.mxu0 %v3387_v27  ;;  %v3821_v27 = vld [vmem:[%s5753_s5 + $0x264] sm:$0xf] }
 0x159   : > { %1939 = vmatpush.bf16.msrb.mxu2 %v3259_v17  ;;  %1953 = vmatpush.bf16.msrb.mxu3 %v3323_v44  ;;  %v3215_v17 = vor.u32 %v3765_v1, %v3212_v40  ;;  %v3204_v44 = vld [vmem:[%s5753_s5 + $0x98] sm:$0xf0]  ;;  %v3420_v1 = vld [vmem:[%s5753_s5 + $0x248] sm:$0xf0]  ;;  %v3799_v40 = vld [vmem:[%s5753_s5 + $0x1b4] sm:$0xf] }
 0x15a   : > { %v3207_v49 = vor.u32 %v3763_v18, %v3204_v44  ;;  %v3815_v18 = vld [vmem:[%s5753_s5 + $0x234] sm:$0xf]  ;;  %v3412_v44 = vld [vmem:[%s5753_s5 + $0x238] sm:$0xf0] }
 0x15d   : > { %1988 = vmatpush.bf16.msra.mxu2 %v3255_v55  ;;  %2002 = vmatpush.bf16.msra.mxu3 %v3319_v47  ;;  %v3260_v55 = vld [vmem:[%s5753_s5 + $0x108] sm:$0xf0] }
 0x15e   : > { %v3263_v56 = vor.u32 %v3777_v52, %v3260_v55  ;;  %v3404_v52 = vld [vmem:[%s5753_s5 + $0x228] sm:$0xf0]  ;;  %v3332_v55 = vld [vmem:[%s5753_s5 + $0x198] sm:$0xf0] }
 0x161   : > { %1989 = vmatpush.bf16.msra.mxu2 %v3247_v4  ;;  %2003 = vmatpush.bf16.msra.mxu3 %v3311_v2  ;;  %v3823_v4 = vld [vmem:[%s5753_s5 + $0x274] sm:$0xf]  ;;  %v3444_v2 = vld [vmem:[%s5753_s5 + $0x278] sm:$0xf0] }
 0x162   : > { %v3447_v14 = vor.u32 %v3823_v4, %v3444_v2 }
 0x165   : > { %1990 = vmatpush.bf16.msra.mxu2 %v3239_v24  ;;  %2004 = vmatpush.bf16.msra.mxu3 %v3303_v53 }
 0x169   : > { %1991 = vmatpush.bf16.msra.mxu2 %v3231_v31  ;;  %2005 = vmatpush.bf16.msra.mxu3 %v3295_v32  ;;  %v3439_v31 = vor.u32 %v3821_v27, %v3436_v22  ;;  %v3367_v32 = vor.u32 %v3803_v28, %v3364_v29 }
 0x16d   : > { %1992 = vmatpush.bf16.msra.mxu2 %v3223_v39  ;;  %2006 = vmatpush.bf16.msra.mxu3 %v3287_v62  ;;  %v3359_v39 = vor.u32 %v3801_v36, %v3356_v37  ;;  %v3817_v62 = vld [vmem:[%s5753_s5 + $0x244] sm:$0xf] }
 0x171   : > { %1993 = vmatpush.bf16.msra.mxu2 %v3215_v17  ;;  %2007 = vmatpush.bf16.msra.mxu3 %v3279_v43  ;;  %v3423_v17 = vor.u32 %v3817_v62, %v3420_v1  ;;  %v3351_v43 = vor.u32 %v3799_v40, %v3348_v41  ;;  %v2046_v40 = vld [vmem:[%s5754_s6] sm:$0x1f] }
 0x175   : > { %1994 = vmatpush.bf16.msra.mxu2 %v3207_v49  ;;  %2008 = vmatpush.bf16.msra.mxu3 %v3271_v50  ;;  %v3340_v49 = vld [vmem:[%s5753_s5 + $0x1a8] sm:$0xf0]  ;;  %v3415_v50 = vor.u32 %v3815_v18, %v3412_v44  ;;  %v3848_v18 = vld [vmem:[%s5757_s9 + $0xb8] sm:$0xff] }
 0x176   : > { %v3343_v51 = vor.u32 %v3797_v46, %v3340_v49  ;;  %v3856_v44 = vld [vmem:[%s5757_s9 + $0xf8] sm:$0xff]  ;;  %v3839_v46 = vld [vmem:[%s5757_s9 + $0x70] sm:$0xff] }
 0x177   : > { %v3847_v49 = vld [vmem:[%s5757_s9 + $0xb0] sm:$0xff] }
 0x179   : > { %1995 = vmatpush.bf16.msra.mxu2 %v3199_v54  ;;  %2009 = vmatpush.bf16.msra.mxu3 %v3263_v56  ;;  %v3795_v54 = vld [vmem:[%s5753_s5 + $0x194] sm:$0xf]  ;;  %v3407_v56 = vor.u32 %v3813_v6, %v3404_v52  ;;  %v3838_v6 = vld [vmem:[%s5757_s9 + $0x68] sm:$0xff]  ;;  %v3829_v52 = vld [vmem:[%s5757_s9 + $0x20] sm:$0xff] }
 0x1bf   : > { %v1352_v33 = vpop.f32.mrf.mxu2  ;;  %v1383_v60 = vpop.f32.mrf.mxu3 }
 0x1c0   : > { %v1389_v47 = vmax.f32 %v1352_v33, %v1383_v60  ;;  %v3335_v33 = vor.u32 %v3795_v54, %v3332_v55  ;;  %v3811_v60 = vld [vmem:[%s5753_s5 + $0x214] sm:$0xf]  ;;  %v3837_v54 = vld [vmem:[%s5757_s9 + $0x60] sm:$0xff]  ;;  %v3828_v55 = vld [vmem:[%s5757_s9 + $0x18] sm:$0xff] }
 0x1c2   : > { %v1395_v7 = vadd.f32 %v3979_v5, %v1389_v47  ;;  %v3396_v47 = vld [vmem:[%s5753_s5 + $0x218] sm:$0xf0] }
 0x1c4   : > { %v1399_v8 = vrot.slane %v1395_v7, 1  ;;  %v1404_v13 = vrot.slane %v1395_v7, 2  ;;  %v1409_v16 = vrot.slane %v1395_v7, 3  ;;  %v1414_v57 = vrot.slane %v1395_v7, 4 }
 0x1c7   : > { %v1355_v10 = vpop.f32.mrf.mxu2  ;;  %v1386_v11 = vpop.f32.mrf.mxu3 }
 0x1c8   : > { %v1390_v58 = vmax.f32 %v1355_v10, %v1386_v11  ;;  %v3399_v10 = vor.u32 %v3811_v60, %v3396_v47  ;;  %v3825_v60 = vld [vmem:[%s5757_s9] sm:$0xff]  ;;  %v3864_v47 = vld [vmem:[%s5757_s9 + $0x138] sm:$0xff] }
 0x1ca   : > { %v1396_v48 = vadd.f32 %v3979_v5, %v1390_v58  ;;  %v3793_v5 = vld [vmem:[%s5753_s5 + $0x184] sm:$0xf] }
 0x1cb   : > { %v3809_v58 = vld [vmem:[%s5753_s5 + $0x204] sm:$0xf] }
 0x1cc   : > { %v1419_v63 = vpack.c.bf16 %v1396_v48, %v1395_v7  ;;  %v1400_v19 = vrot.slane %v1396_v48, 1  ;;  %v1405_v20 = vrot.slane %v1396_v48, 2  ;;  %v1410_v21 = vrot.slane %v1396_v48, 3  ;;  %v3324_v7 = vld [vmem:[%s5753_s5 + $0x188] sm:$0xf0] }
 0x1cd   : > { %v1415_v30 = vrot.slane %v1396_v48, 4  ;;  %v3327_v11 = vor.u32 %v3793_v5, %v3324_v7  ;;  %v3391_v15 = vor.u32 %v3809_v58, %v3388_v12  ;;  %v3863_v5 = vld [vmem:[%s5757_s9 + $0x130] sm:$0xff]  ;;  %v3846_v7 = vld [vmem:[%s5757_s9 + $0xa8] sm:$0xff]  ;;  %v3853_v58 = vld [vmem:[%s5757_s9 + $0xe0] sm:$0xff] }
 0x1ce   : > { %1912 = vmatmul.bf16.vlgmr.msrb.gmra.mxu0 %v1419_v63  ;;  %v1401_v24 = vsel %vm591_vm0, %v1399_v8, %v1400_v19  ;;  %v1406_v53 = vsel %vm603_vm1, %v1404_v13, %v1405_v20  ;;  %v1411_v3 = vsel %vm615_vm2, %v1409_v16, %v1410_v21  ;;  %v3836_v12 = vld [vmem:[%s5757_s9 + $0x58] sm:$0xff] }
 0x1cf   : > { %2016 = vmatpush.bf16.msrb.mxu0 %v3383_v59  ;;  %v1420_v61 = vpack.c.bf16 %v1400_v19, %v1401_v24  ;;  %v1421_v0 = vpack.c.bf16 %v1405_v20, %v1406_v53  ;;  %v5482_v25 = vpack.c.bf16 %v1410_v21, %v1411_v3  ;;  %v1416_v42 = vsel %vm627_vm3, %v1414_v57, %v1415_v30 }
 0x1d0   : > { %v1423_v45 = vpack.c.bf16 %v1415_v30, %v1416_v42  ;;  %v2075_v42 = vld [vmem:[#allocation2] sm:$0x1f] }
 0x1d1   : > { %1926 = vmatmul.bf16.vlgmr.msrb.gmra.mxu1 %v1420_v61  ;;  %1940 = vmatmul.bf16.vlgmr.msrb.gmra.mxu2 %v1421_v0 }
 0x1d2   : > { %1954 = vmatmul.bf16.vlgmr.msrb.gmra.mxu3 %v5482_v25  ;;  %2030 = vmatpush.bf16.msrb.mxu1 %v3447_v14 }
 0x1d3   : > { %2017 = vmatpush.bf16.msrb.mxu0 %v3375_v26 }
 0x1d6   : > { %2031 = vmatpush.bf16.msrb.mxu1 %v3439_v31 }
 0x1d7   : > { %2018 = vmatpush.bf16.msrb.mxu0 %v3367_v32 }
 0x1da   : > { %2032 = vmatpush.bf16.msrb.mxu1 %v3431_v38 }
 0x1db   : > { %2019 = vmatpush.bf16.msrb.mxu0 %v3359_v39 }
 0x1de   : > { %1968 = vmatmul.bf16.vlgmr.msra.gmra.mxu0 %v1423_v45  ;;  %2033 = vmatpush.bf16.msrb.mxu1 %v3423_v17  ;;  %v3832_v17 = vld [vmem:[%s5757_s9 + $0x38] sm:$0xff] }
 0x1df   : > { %2020 = vmatpush.bf16.msrb.mxu0 %v3351_v43  ;;  %v3840_v43 = vld [vmem:[%s5757_s9 + $0x78] sm:$0xff] }
 0x1e1   : > { %1982 = vmatmul.bf16.vlgmr.msra.gmra.mxu1 %v1419_v63  ;;  %1996 = vmatmul.bf16.vlgmr.msra.gmra.mxu2 %v1420_v61 }
 0x1e2   : > { %2010 = vmatmul.bf16.vlgmr.msra.gmra.mxu3 %v1421_v0  ;;  %2034 = vmatpush.bf16.msrb.mxu1 %v3415_v50  ;;  %v3855_v50 = vld [vmem:[%s5757_s9 + $0xf0] sm:$0xff] }
 0x1e3   : > { %2021 = vmatpush.bf16.msrb.mxu0 %v3343_v51  ;;  %v3830_v51 = vld [vmem:[%s5757_s9 + $0x28] sm:$0xff] }
 0x1e6   : > { %2035 = vmatpush.bf16.msrb.mxu1 %v3407_v56  ;;  %v3827_v56 = vld [vmem:[%s5757_s9 + $0x10] sm:$0xff] }
 0x1e7   : > { %2022 = vmatpush.bf16.msrb.mxu0 %v3335_v33  ;;  %v3826_v33 = vld [vmem:[%s5757_s9 + $0x8] sm:$0xff] }
 0x1ea   : > { %2036 = vmatpush.bf16.msrb.mxu1 %v3399_v10  ;;  %v3854_v10 = vld [vmem:[%s5757_s9 + $0xe8] sm:$0xff] }
 0x1eb   : > { %2023 = vmatpush.bf16.msrb.mxu0 %v3327_v11  ;;  %v3845_v11 = vld [vmem:[%s5757_s9 + $0xa0] sm:$0xff] }
 0x1ee   : > { %2024 = vmatmul.bf16.vlgmr.msrb.gmra.mxu0 %v5482_v25  ;;  %2037 = vmatpush.bf16.msrb.mxu1 %v3391_v15  ;;  %v3844_v15 = vld [vmem:[%s5757_s9 + $0x98] sm:$0xff] }
 0x1ef   : > { %2466 = vmatpush.bf16.msra.mxu0 %v3848_v18 }
 0x1f1   : > { %2038 = vmatmul.bf16.vlgmr.msrb.gmra.mxu1 %v1423_v45  ;;  %v3831_v45 = vld [vmem:[%s5757_s9 + $0x30] sm:$0xff] }
 0x1f2   : > { %2479 = vmatpush.bf16.msra.mxu1 %v3856_v44 }
 0x1f3   : > { %2467 = vmatpush.bf16.msra.mxu0 %v3847_v49 }
 0x1f6   : > { %2480 = vmatpush.bf16.msra.mxu1 %v3855_v50  ;;  %v3876_v50 = vld [vmem:[#allocation10 + $0x20] sm:$0xff] }
 0x1f7   : > { %2468 = vmatpush.bf16.msra.mxu0 %v3846_v7 }
 0x1fa   : > { %2481 = vmatpush.bf16.msra.mxu1 %v3854_v10 }
 0x1fb   : > { %2469 = vmatpush.bf16.msra.mxu0 %v3845_v11 }
 0x1fe   : > { %2482 = vmatpush.bf16.msra.mxu1 %v3853_v58 }
 0x1ff   : > { %2470 = vmatpush.bf16.msra.mxu0 %v3844_v15 }
 0x24b   : > { %v1913_v48 = vpop.f32.mrf.mxu0 }
 0x24e   : > { %v1927_v4 = vpop.f32.mrf.mxu1 }
 0x24f   : > { %v1928_v26 = vadd.f32 %v1927_v4, %v1913_v48  ;;  %v3852_v48 = vld [vmem:[%s5757_s9 + $0xd8] sm:$0xff]  ;;  %v3835_v4 = vld [vmem:[%s5757_s9 + $0x50] sm:$0xff] }
 0x250   : > { %2483 = vmatpush.bf16.msra.mxu1 %v3852_v48 }
 0x253   : > { %v1915_v2 = vpop.f32.mrf.mxu0 }
 0x254   : > { %v1941_v59 = vpop.f32.mrf.mxu2 }
 0x255   : > { %v1955_v8 = vpop.f32.mrf.mxu3  ;;  %v1942_v31 = vadd.f32 %v1941_v59, %v1928_v26  ;;  %v3851_v59 = vld [vmem:[%s5757_s9 + $0xd0] sm:$0xff] }
 0x256   : > { %v1929_v13 = vpop.f32.mrf.mxu1  ;;  %2484 = vmatpush.bf16.msra.mxu1 %v3851_v59  ;;  %v3871_v26 = vld [vmem:[%s5759_s11 + $0x30] sm:$0xff] }
 0x257   : > { %v1930_v25 = vadd.f32 %v1929_v13, %v1915_v2  ;;  %v1956_v30 = vadd.f32 %v1955_v8, %v1942_v31  ;;  %v3843_v2 = vld [vmem:[%s5757_s9 + $0x90] sm:$0xff]  ;;  %v3862_v8 = vld [vmem:[%s5757_s9 + $0x128] sm:$0xff] }
 0x258   : > { %2471 = vmatpush.bf16.msra.mxu0 %v3843_v2  ;;  %v3834_v13 = vld [vmem:[%s5757_s9 + $0x48] sm:$0xff]  ;;  %v3873_v2 = vld [vmem:[#allocation10 + $0x8] sm:$0xff] }
 0x259   : > { %v3872_v59 = vld [vmem:[#allocation10] sm:$0xff] }
 0x25b   : > { %v1969_v16 = vpop.f32.mrf.mxu0 }
 0x25c   : > { %v1943_v9 = vpop.f32.mrf.mxu2  ;;  %v1970_v62 = vadd.f32 %v1969_v16, %v1956_v30  ;;  %v3842_v16 = vld [vmem:[%s5757_s9 + $0x88] sm:$0xff] }
 0x25d   : > { %v1957_v63 = vpop.f32.mrf.mxu3  ;;  %v1944_v27 = vadd.f32 %v1943_v9, %v1930_v25  ;;  %v3850_v9 = vld [vmem:[%s5757_s9 + $0xc8] sm:$0xff]  ;;  %2472 = vmatpush.bf16.msra.mxu0 %v3842_v16 }
 0x25e   : > { %v1983_v19 = vpop.f32.mrf.mxu1  ;;  %2485 = vmatpush.bf16.msra.mxu1 %v3850_v9 }
 0x25f   : > { %v1958_v36 = vadd.f32 %v1957_v63, %v1944_v27  ;;  %v3861_v63 = vld [vmem:[%s5757_s9 + $0x120] sm:$0xff]  ;;  %v3980_v27 = vld [vmem:[#allocation5] ss:$0 sm:$0xff] }
 0x263   : > { %v1971_v20 = vpop.f32.mrf.mxu0 }
 0x264   : > { %v1997_v21 = vpop.f32.mrf.mxu2  ;;  %v1972_v38 = vadd.f32 %v1971_v20, %v1958_v36  ;;  %v3841_v20 = vld [vmem:[%s5757_s9 + $0x80] sm:$0xff] }
 0x265   : > { %v2011_v24 = vpop.f32.mrf.mxu3  ;;  %v1998_v14 = vadd.f32 %v1997_v21, %v1983_v19  ;;  %v3833_v19 = vld [vmem:[%s5757_s9 + $0x40] sm:$0xff]  ;;  %2473 = vmatpush.bf16.msra.mxu0 %v3841_v20  ;;  %v2601_v20 = vld [vmem:[#allocation11] sm:$0x1] }
 0x266   : > { %v1985_v23 = vpop.f32.mrf.mxu1  ;;  %v3849_v21 = vld [vmem:[%s5757_s9 + $0xc0] sm:$0xff] }
 0x267   : > { %v2012_v22 = vadd.f32 %v2011_v24, %v1998_v14  ;;  %2486 = vmatpush.bf16.msra.mxu1 %v3849_v21  ;;  %v3859_v24 = vld [vmem:[%s5757_s9 + $0x110] sm:$0xff]  ;;  %v2521_v14 = vld [vmem:[%s5759_s11 + $0x38] sm:$0xf] }
 0x26b   : > { %v2025_v53 = vpop.f32.mrf.mxu0 }
 0x26c   : > { %v1999_v3 = vpop.f32.mrf.mxu2  ;;  %v2026_v32 = vadd.f32 %v2025_v53, %v2012_v22  ;;  %v3858_v53 = vld [vmem:[%s5757_s9 + $0x108] sm:$0xff] }
 0x26d   : > { %v2000_v61 = vadd.f32 %v1999_v3, %v1985_v23  ;;  %v2013_v28 = vpop.f32.mrf.mxu3  ;;  %v3860_v23 = vld [vmem:[%s5757_s9 + $0x118] sm:$0xff]  ;;  %v3857_v3 = vld [vmem:[%s5757_s9 + $0x100] sm:$0xff] }
 0x26e   : > { %v2039_v0 = vpop.f32.mrf.mxu1 }
 0x26f   : > { %v2014_v29 = vadd.f32 %v2013_v28, %v2000_v61  ;;  %v2040_v39 = vadd.f32 %v2039_v0, %v2026_v32  ;;  %v2552_v61 = vunpack.c.l.b16 %v2521_v14 }
 0x271   : > { %v2044_v41 = vmax.f32 %v1970_v62, %v2040_v39  ;;  %v2560_v0 = vpack.c.b16 %v2552_v61, %v2552_v61  ;;  %v3870_v62 = vld [vmem:[%s5759_s11 + $0x28] sm:$0xff] }
 0x273   : > { %v2027_v34 = vpop.f32.mrf.mxu0  ;;  %v2573_v25 = vsel %vm627_vm3, %v2560_v0, 0 }
 0x274   : > { %v2028_v35 = vadd.f32 %v2027_v34, %v2014_v29 }
 0x276   : > { %v2041_v37 = vpop.f32.mrf.mxu1 }
 0x277   : > { %v2042_v57 = vadd.f32 %v2041_v37, %v2028_v35 }
 0x279   : > { %v2045_v1 = vmax.f32 %v1972_v38, %v2042_v57 }
 0x27b   : > { %3448 = vmatpush.msk.msrb.mxu2 %vm2051_vm5, %v2045_v1  ;;  %3450 = vmatpush.msk.msrb.mxu3 %vm2051_vm5, %v2045_v1  ;;  %v3869_v1 = vld [vmem:[%s5759_s11 + $0x20] sm:$0xff] }
 0x27d   : > { %2070 = vmatpush.msrb.mxu2 %v2044_v41  ;;  %2094 = vmatpush.msrb.mxu3 %v2044_v41  ;;  %v3867_v41 = vld [vmem:[%s5759_s11 + $0x10] sm:$0xff] }
 0x27e   : > { %3449 = vmatmul.msk.f32.vlgmr.msrb.gmra.mxu2 %vm2047_vm6, %v2046_v40  ;;  %3451 = vmatmul.msk.f32.vlgmr.msrb.gmra.mxu3 %vm2047_vm6, %v2075_v42  ;;  %v3868_v40 = vld [vmem:[%s5759_s11 + $0x18] sm:$0xff]  ;;  %v3866_v42 = vld [vmem:[%s5759_s11 + $0x8] sm:$0xff] }
 0x27f   : > { %2440 = vmatpush.bf16.msra.mxu2 %v3832_v17  ;;  %2453 = vmatpush.bf16.msra.mxu3 %v3840_v43  ;;  %v3865_v17 = vld [vmem:[%s5759_s11] sm:$0xff]  ;;  %v2600_v43 = vld [vmem:[#allocation10 + $0x28] sm:$0x3] }
 0x280   : > { %v2623_v18 = vunpack.c.l.b16 %v2600_v43 }
 0x282   : > { %v2629_v44 = vpack.c.b16 %v2623_v18, %v2623_v18 }
 0x283   : > { %2441 = vmatpush.bf16.msra.mxu2 %v3831_v45  ;;  %2454 = vmatpush.bf16.msra.mxu3 %v3839_v46 }
 0x284   : > { %v2640_v49 = vsel %vm2051_vm5, %v2629_v44, 0 }
 0x285   : > { %2644 = vmatpush.bf16.msrb.mxu0 %v2640_v49 }
 0x287   : > { %2442 = vmatpush.bf16.msra.mxu2 %v3830_v51  ;;  %2455 = vmatpush.bf16.msra.mxu3 %v3838_v6  ;;  %v2199_v51 = vld [vmem:[#allocation7] sm:$0x1] }
 0x289   : > { %2645 = vmatpush.bf16.msrb.mxu0 %v3876_v50 }
 0x28b   : > { %2443 = vmatpush.bf16.msra.mxu2 %v3829_v52  ;;  %2456 = vmatpush.bf16.msra.mxu3 %v3837_v54  ;;  %v3875_v54 = vld [vmem:[#allocation10 + $0x18] sm:$0xff] }
 0x28d   : > { %2646 = vmatpush.bf16.msrb.mxu0 %v3875_v54 }
 0x28f   : > { %2444 = vmatpush.bf16.msra.mxu2 %v3828_v55  ;;  %2457 = vmatpush.bf16.msra.mxu3 %v3836_v12 }
 0x293   : > { %2445 = vmatpush.bf16.msra.mxu2 %v3827_v56  ;;  %2458 = vmatpush.bf16.msra.mxu3 %v3835_v4 }
 0x297   : > { %2446 = vmatpush.bf16.msra.mxu2 %v3826_v33  ;;  %2459 = vmatpush.bf16.msra.mxu3 %v3834_v13 }
 0x29b   : > { %2447 = vmatpush.bf16.msra.mxu2 %v3825_v60  ;;  %2460 = vmatpush.bf16.msra.mxu3 %v3833_v19  ;;  %v3874_v60 = vld [vmem:[#allocation10 + $0x10] sm:$0xff] }
 0x29c   : > { %2647 = vmatpush.bf16.msrb.mxu0 %v3874_v60 }
 0x29f   : > { %2492 = vmatpush.bf16.msrb.mxu2 %v3864_v47  ;;  %2575 = vmatpush.bf16.msrb.mxu3 %v2573_v25 }
 0x2a0   : > { %2648 = vmatpush.bf16.msrb.mxu0 %v3873_v2 }
 0x2a3   : > { %2493 = vmatpush.bf16.msrb.mxu2 %v3863_v5  ;;  %2576 = vmatpush.bf16.msrb.mxu3 %v3871_v26 }
 0x2a4   : > { %2649 = vmatpush.bf16.msrb.mxu0 %v3872_v59 }
 0x2a7   : > { %2494 = vmatpush.bf16.msrb.mxu2 %v3862_v8  ;;  %2577 = vmatpush.bf16.msrb.mxu3 %v3870_v62  ;;  %v2522_v8 = vld [vmem:[#allocation8] sm:$0x1] }
 0x2ab   : > { %2495 = vmatpush.bf16.msrb.mxu2 %v3861_v63  ;;  %2578 = vmatpush.bf16.msrb.mxu3 %v3869_v1 }
 0x2af   : > { %2496 = vmatpush.bf16.msrb.mxu2 %v3860_v23  ;;  %2579 = vmatpush.bf16.msrb.mxu3 %v3868_v40 }
 0x2b3   : > { %2497 = vmatpush.bf16.msrb.mxu2 %v3859_v24  ;;  %2580 = vmatpush.bf16.msrb.mxu3 %v3867_v41 }
 0x2b7   : > { %2498 = vmatpush.bf16.msrb.mxu2 %v3858_v53  ;;  %2581 = vmatpush.bf16.msrb.mxu3 %v3866_v42 }
 0x2bb   : > { %2499 = vmatpush.bf16.msrb.mxu2 %v3857_v3  ;;  %2582 = vmatpush.bf16.msrb.mxu3 %v3865_v17 }
 0x301   : > { %v2072_v22 = vpop.f32.mrf.mxu2  ;;  %v2096_v28 = vpop.f32.mrf.mxu3 }
 0x302   : > { %v2099_v29 = vmax.f32 %v2072_v22, %v2096_v28 }
 0x304   : > { %v2104_v31 = vadd.f32 %v3980_v27, %v2099_v29 }
 0x306   : > { %v2114_v32 = vpack.c.bf16 %v2104_v31, %v2104_v31  ;;  %v2106_v34 = vrot.slane %v2104_v31, 1  ;;  %v2108_v35 = vrot.slane %v2104_v31, 2  ;;  %v2110_v36 = vrot.slane %v2104_v31, 3 }
 0x307   : > { %v2112_v39 = vrot.slane %v2104_v31, 4 }
 0x308   : > { %2448 = vmatmul.bf16.vlgmr.msra.gmra.mxu2 %v2114_v32  ;;  %v2115_v37 = vpack.c.bf16 %v2106_v34, %v2106_v34  ;;  %v2116_v30 = vpack.c.bf16 %v2108_v35, %v2108_v35  ;;  %v2117_v38 = vpack.c.bf16 %v2110_v36, %v2110_v36 }
 0x309   : > { %v2118_v57 = vpack.c.bf16 %v2112_v39, %v2112_v39 }
 0x30a   : > { %2461 = vmatmul.bf16.vlgmr.msra.gmra.mxu3 %v2115_v37  ;;  %2474 = vmatmul.bf16.vlgmr.msra.gmra.mxu0 %v2116_v30 }
 0x30b   : > { %2487 = vmatmul.bf16.vlgmr.msra.gmra.mxu1 %v2117_v38 }
 0x318   : > { %2500 = vmatmul.bf16.vlgmr.msrb.gmra.mxu2 %v2118_v57 }
 0x387   : > { %v2475_v45 = vpop.f32.mrf.mxu0 }
 0x388   : > { %v2488_v46 = vpop.f32.mrf.mxu1 }
 0x38b   : > { %v2449_v6 = vpop.f32.mrf.mxu2 }
 0x38c   : > { %v2450_v55 = vadd.f32 %v2449_v6, %v2199_v51 }
 0x38d   : > { %v2462_v52 = vpop.f32.mrf.mxu3 }
 0x38e   : > { %v2463_v47 = vadd.f32 %v2462_v52, %v2450_v55 }
 0x38f   : > { %v2477_v56 = vpop.f32.mrf.mxu0 }
 0x390   : > { %v2490_v33 = vpop.f32.mrf.mxu1  ;;  %v2476_v10 = vadd.f32 %v2475_v45, %v2463_v47 }
 0x392   : > { %v2489_v11 = vadd.f32 %v2488_v46, %v2476_v10 }
 0x393   : > { %v2451_v5 = vpop.f32.mrf.mxu2 }
 0x395   : > { %v2464_v7 = vpop.f32.mrf.mxu3 }
 0x39b   : > { %v2501_v58 = vpop.f32.mrf.mxu2 }
 0x39c   : > { %v2502_v12 = vadd.f32 %v2501_v58, %v2489_v11 }
 0x39e   : > { %v2505_v15 = vmax.f32 %v2502_v12, 0.0 }
 0x3a0   : > { %v2506_v48 = vpack.c.bf16 %v2505_v15, %v2505_v15 }
 0x3a2   : > { %3640 = vmatmul.msk.bf16.vlgmr.msrb.gmra.mxu3 %vm2568_vm7, %v2506_v48 }
 0x3a3   : > { %v2503_v4 = vpop.f32.mrf.mxu2 }
 0x425   : > { %v2584_v13 = vpop.f32.mrf.mxu3 }
 0x426   : > { %v2585_v16 = vadd.f32 %v2584_v13, %v2522_v8 }
 0x428   : > { %v2588_v9 = vmax.f32 %v2585_v16, 0.0 }
 0x42a   : > { %v2589_v63 = vpack.c.bf16 %v2588_v9, %v2588_v9 }
 0x42c   : > { %3661 = vmatmul.msk.bf16.vlgmr.msrb.gmra.mxu0 %vm2635_vm8, %v2589_v63 }
 0x42d   : > { %v2586_v19 = vpop.f32.mrf.mxu3 }
 0x4a9   : > { %v2651_v21 = vpop.f32.mrf.mxu0 }
 0x4aa   : > { %v2652_v23 = vadd.f32 %v2651_v21, %v2601_v20 }
 0x4ac   : > { %2655 = vst [vmem:[%s576_s12] sm:$0x1] %v2652_v23 }
 0x4ad   : > { %4188 = shalt.err (!%p4185_p8)
}
 0x4ae   : > { %3901 = dma.vmem_to_hbm [thread:$0]  (%p4367_p5), %s2668_s27, 16, %s2670_s8, %s2657_s28  }
 0x4b1   : > { %v2653_v24 = vpop.f32.mrf.mxu0 }
 0x4b2 PF: > { %s5790_s23 = sld [smem:[#allocation21_spill]] }
 0x4b3   : > { %s5791_s24 = sld [smem:[#allocation19_spill]] }
 0x4b8   : > { %p3938_p9 = scmp.ge.s32.totalorder %s5790_s23, 2 }
 0x4b9   : > { %s2681_s25 = sand.u32 1, %s5791_s24  }
 0x4ba   : > { %p3923_p10 = pnand %p3938_p9, %p4371_p6  ;;  %s2682_s20 = scalar_lea.sflag [#allocation4], %s2681_s25 }
 0x4bc   : > { %p3924_p11 = pneg %p3923_p10 }
 0x4be   : > { %4222 = dma.done.wait (%p3924_p11), %s2682_s20, 16  }
 0x4bf   : > { %4224 = vsyncadd (%p3924_p11), %s2682_s20, 4294967280  ;;  %s5793_s21 = sld [smem:[#allocation22_spill]]  ;;  %s5796_s18 = smov %s4231_s19 }
 0x4c0   : > { %s5794_s12 = sld [smem:[#allocation20_spill]] }
 0x4c1   : > { %s5795_s20 = sld [smem:[#allocation23_spill]] }
 0x4c5   : > { %p29_p12 = scmp.ge.s32.totalorder %s5793_s21, 4  }
 0x4c6   : > { %s5797_s19 = smov %s5794_s12 }
 0x4c7   :  { %31 = sbr.rel (!%p29_p12) target bundleno = 11 (0xb), region = 140 }
 0x4cc   :  { %2687 = vsyncpa [#allocation3], 1 }
 0x4cd   :  { %2689 = vsyncpa [#allocation3 + $0x1], 1 }
 0x4ce   :  { %2690 = vsyncpa [#allocation6], 1 }
 0x4cf   :  { %2691 = vsyncpa [#allocation9], 1 }
 0x4d0   :  { %2692 = vsyncpa [#allocation12], 1 }
 0x4d1   :  { %2693 = vsyncpa [#allocation4], 1 }
 0x4d2   :  { %2695 = vsyncpa [#allocation4 + $0x1], 1 }

</bundles_post_ra>
